<compile_context>
chip_gen: v6e
topology: v6e:2x2x1
jax: 0.10.0
libtpu: 0.0.40
codegen_flags: <defaults>
</compile_context>

<pallas_src>
import functools

import numpy as np
import jax
import jax.numpy as jnp
from jax.experimental import pallas as pl
from jax.experimental.pallas import tpu as pltpu

# ---- small, self-consistent hyperparameters --------------------------------
# (fc is hard-coded to Linear(16*3*1, n_classes) => the final pooled width must
#  be 3; kernelLength=8 / samples=240 satisfies that at small scale.)
N, CH, S = 4, 4, 240          # batch, EEG channels, samples
K, F1, D, F2, NC = 8, 8, 2, 16, 4
F1D = F1 * D                  # 16
F1CH = F1 * CH                # 32
KCH = K * CH                  # 32
K2 = K // 2                   # conv4 temporal kernel = 4

T1 = S - K + 1                # 233  conv1 output width
T2 = (T1 - 2) // 2 + 1        # 116  after AvgPool(1,2)
T3 = T2 - K + 1               # 109  after separable depthwise conv
T3P = (T3 - 4) // 4 + 1       # 27   after AvgPool(1,4)
T4 = T3P - K2 + 1             # 24   conv4 output width
T4P = (T4 - 8) // 8 + 1       # 3    after AvgPool(1,8)
assert F2 * T4P * 1 == 48     # matches nn.Linear(16*3*1, n_classes)
assert T4 == 8 * T4P

# padded, lane-aligned per-sample segment lengths for the lane-batched layout
L1, L2, L3 = 256, 128, 128
assert T1 <= L1 and T2 <= L2 and T3 <= L2 and T3P <= L3 and T4 <= L3

# packed weight-slab row offsets (slab A has KCH==F1CH cols, slab B has F1D==F2 cols)
assert KCH == F1CH and F1D == F2
WA_W1E, WA_W2F, WA_ECA = 0, F1CH, F1CH + F1D
WA_ROWS = F1CH + 2 * F1D                       # (64, 32) bf16
WB_W3, WB_W4 = 0, K * F2
WB_ROWS = K * F2 + K2 * F2                     # (192, 16) bf16
NBIAS = 8


def _hexpo(v):
    # Hexpo (a=b=c=d=1): x>=0 -> 1-exp(-x) ; x<0 -> exp(x)-1.  Single-exp form.
    e = jnp.exp(-jnp.abs(v))
    return jnp.where(v >= 0.0, 1.0 - e, e - 1.0)


def _amcnn_kernel(xh_ref, wa_ref, wb_ref, ps1_ref, ps2_ref,
                  eseg_ref, bias_ref, seg3_ref, out_ref, *, nt):
    f32, bf16 = jnp.float32, jnp.bfloat16
    ntl1, ntl2, ntl3 = nt * L1, nt * L2, nt * L3

    # ---- hoisted constant loads (each loaded exactly once per grid step) ----
    w1e = wa_ref[WA_W1E:WA_W1E + F1CH, :]          # conv1 im2col weights (BN1 folded)
    w2f = wa_ref[WA_W2F:WA_W2F + F1D, :]           # depthwise conv2 (BN2 folded)
    weca = wa_ref[WA_ECA:WA_ECA + F1D, :]          # ECA: GAP + k=3 conv + group row-dup folded
    b1 = bias_ref[:, 0:1]
    b2 = bias_ref[0:F1D, 1:2]
    b3 = bias_ref[0:F2, 2:3]
    b4 = bias_ref[0:F2, 3:4]
    fcb = bias_ref[0:NC, 4:5]

    xh = xh_ref[0]                                 # (KCH, ntl1) bf16: host im2col, NT samples on lanes

    # ---- conv1 (1 x K, shared over EEG chans) + BN1: one bf16 MXU dot ----
    a1 = jnp.dot(w1e, xh, preferred_element_type=f32) + b1                  # (F1CH, ntl1)
    a1b = a1.astype(bf16)

    # ---- ECA gate: per-sample GAP (segmented lane sum) -> sigmoid(k=3 conv) ----
    rs = jnp.dot(a1b, ps1_ref[:, ntl2:ntl2 + nt], preferred_element_type=f32)   # (F1CH, nt)
    z = jnp.dot(weca, rs.astype(bf16), preferred_element_type=f32)              # (F1D, nt)
    gate = 1.0 / (1.0 + jnp.exp(-z))
    gate_l = jnp.dot(gate, eseg_ref[...], preferred_element_type=f32)           # (F1D, ntl1)

    # ---- depthwise conv2 (collapses EEG chans) + BN2 + Hexpo; the ECA gate is
    #      constant per conv group so it commutes with the conv and is applied after ----
    h2 = _hexpo(jnp.dot(w2f, a1b, preferred_element_type=f32) * gate_l + b2)    # (F1D, ntl1)

    # ---- AvgPool(1,2): segmented pooling matmul (dropout2 = identity) ----
    p2 = jnp.dot(h2.astype(bf16), ps1_ref[:, 0:ntl2], preferred_element_type=f32)   # (F1D, ntl2)

    # ---- SeparableConv2d (+sep.bn+BN3 folded): K shifted matmul-accumulates ----
    h3 = jnp.dot(wb_ref[WB_W3:WB_W3 + F2, :], p2.astype(bf16), preferred_element_type=f32)
    for k in range(1, K):
        pk = pltpu.roll(p2, shift=ntl2 - k, axis=1).astype(bf16)    # pk[:, c] = p2[:, c + k]
        h3 = h3 + jnp.dot(wb_ref[WB_W3 + k * F2:WB_W3 + (k + 1) * F2, :], pk,
                          preferred_element_type=f32)
    h3 = _hexpo(h3 + b3)                                                        # (F2, ntl2)

    # ---- AvgPool(1,4): segmented pooling matmul (reads only valid conv3 cols) ----
    p3 = jnp.dot(h3.astype(bf16), ps2_ref[0:ntl2, :], preferred_element_type=f32)   # (F2, ntl3)

    # ---- conv4 (1 x K/2, no bias) + BN4: K2 shifted matmul-accumulates ----
    h4 = jnp.dot(wb_ref[WB_W4:WB_W4 + F2, :], p3.astype(bf16), preferred_element_type=f32)
    for k in range(1, K2):
        pk = pltpu.roll(p3, shift=ntl3 - k, axis=1).astype(bf16)
        h4 = h4 + jnp.dot(wb_ref[WB_W4 + k * F2:WB_W4 + (k + 1) * F2, :], pk,
                          preferred_element_type=f32)
    h4 = _hexpo(h4 + b4)                                                         # (F2, ntl3)

    # ---- AvgPool(1,8)+Flatten+fc fused into per-class masks (zero outside the
    #      valid columns); VPU mul + sublane reduce, then segmented lane sum ----
    rows = []
    for o in range(NC):
        mo = ps2_ref[ntl2 + o * F2:ntl2 + (o + 1) * F2, :].astype(f32)           # (F2, ntl3)
        rows.append(jnp.sum(h4 * mo, axis=0, keepdims=True))                     # (1, ntl3)
    pre = jnp.concatenate(rows, axis=0)                                          # (NC, ntl3)
    logits = jnp.dot(pre, seg3_ref[...], preferred_element_type=f32) + fcb       # (NC, nt)

    # ---- softmax over classes (sublane axis); batch stays on the lane axis ----
    m = jnp.max(logits, axis=0, keepdims=True)
    e = jnp.exp(logits - m)
    out_ref[0] = e / jnp.sum(e, axis=0, keepdims=True)                           # (NC, nt)


def _seg_mats(nt, mfc):
    """NT-dependent segmented pooling / gate-expansion / fc matrices (host numpy, tiny)."""
    ntl1, ntl2, ntl3 = nt * L1, nt * L2, nt * L3
    ps1 = np.zeros((ntl1, ntl2 + nt), np.float32)        # [:, :ntl2]=AvgPool(1,2), [:, ntl2:]=GAP
    ps2 = np.zeros((ntl2 + NC * F2, ntl3), np.float32)   # [:ntl2]=AvgPool(1,4), [ntl2:]=fc masks
    eseg = np.zeros((nt, ntl1), np.float32)              # gate lane-expansion per segment
    seg3 = np.zeros((ntl3, nt), np.float32)              # per-sample lane sum for the logits
    for s in range(nt):
        for u in range(T2):
            ps1[s * L1 + 2 * u, s * L2 + u] = 0.5
            ps1[s * L1 + 2 * u + 1, s * L2 + u] = 0.5
        ps1[s * L1:s * L1 + T1, ntl2 + s] = 1.0
        for u in range(T3P):
            ps2[s * L2 + 4 * u:s * L2 + 4 * u + 4, s * L3 + u] = 0.25
        for o in range(NC):
            ps2[ntl2 + o * F2:ntl2 + (o + 1) * F2, s * L3:s * L3 + T4] = mfc[o]
        eseg[s, s * L1:(s + 1) * L1] = 1.0
        seg3[s * L3:(s + 1) * L3, s] = 1.0
    return (jnp.asarray(ps1, jnp.bfloat16), jnp.asarray(ps2, jnp.bfloat16),
            jnp.asarray(eseg, jnp.float32), jnp.asarray(seg3, jnp.float32))


def amcnn_forward(x_nchw, params, num_blocks=2):
    """num_blocks >= 2 feeds both v7x TensorCores; num_blocks=1 (whole batch in one
    step) is optimal on single-TC v5e/v6e."""
    wa, wb, bias, mfc = params
    x = x_nchw[:, 0, :, :]                                # (N, CH, S)
    nb = x.shape[0]
    g = max(1, min(num_blocks, nb))
    nt = -(-nb // g)                                      # samples per grid step
    npad = g * nt
    if npad != nb:                                        # pad batch to a multiple of nt
        x = jnp.concatenate([x, jnp.zeros((npad - nb, CH, S), x.dtype)], axis=0)
    ntl1, ntl2, ntl3 = nt * L1, nt * L2, nt * L3

    # host-side conv1 im2col: K shifted windows stacked on rows, zero-padded to L1,
    # NT samples concatenated on the time/lane axis per grid block, bf16 for the MXU.
    wins = jnp.stack([x[:, :, k:k + T1] for k in range(K)], axis=1)     # (npad, K, CH, T1)
    wins = jnp.pad(wins.reshape(npad, KCH, T1), ((0, 0), (0, 0), (0, L1 - T1)))
    xh = (wins.reshape(g, nt, KCH, L1).transpose(0, 2, 1, 3)
              .reshape(g, KCH, ntl1).astype(jnp.bfloat16))

    ps1, ps2, eseg, seg3 = _seg_mats(nt, mfc)

    out = pl.pallas_call(
        functools.partial(_amcnn_kernel, nt=nt),
        out_shape=jax.ShapeDtypeStruct((g, NC, nt), jnp.float32),
        grid=(g,),
        in_specs=[
            pl.BlockSpec((1, KCH, ntl1), lambda i: (i, 0, 0)),        # input (per grid block)
            pl.BlockSpec((WA_ROWS, KCH), lambda i: (0, 0)),           # weight slab A (bf16)
            pl.BlockSpec((WB_ROWS, F2), lambda i: (0, 0)),            # weight slab B (bf16)
            pl.BlockSpec((ntl1, ntl2 + nt), lambda i: (0, 0)),        # pool2 + GAP matrices
            pl.BlockSpec((ntl2 + NC * F2, ntl3), lambda i: (0, 0)),   # pool3 + fc masks
            pl.BlockSpec((nt, ntl1), lambda i: (0, 0)),               # gate lane expansion
            pl.BlockSpec((F1CH, NBIAS), lambda i: (0, 0)),            # packed biases
            pl.BlockSpec((ntl3, nt), lambda i: (0, 0)),               # per-sample logit sum
        ],
        out_specs=pl.BlockSpec((1, NC, nt), lambda i: (i, 0, 0)),
        compiler_params=pltpu.CompilerParams(dimension_semantics=("parallel",)),
    )(xh, wa, wb, ps1, ps2, eseg, bias, seg3)

    return out.transpose(0, 2, 1).reshape(npad, NC)[:nb]              # (N, NC)


# ---------------- deterministic parameter construction (host-side folding) ----
def make_params(key):
    ks = jax.random.split(key, 16)
    nrm = lambda k, s, sc=0.1: np.asarray(jax.random.normal(k, s), np.float32) * sc
    uni = lambda k, s, lo, hi: np.asarray(
        jax.random.uniform(k, s, minval=lo, maxval=hi), np.float32)

    def bn_fold(k, c, eps):
        kg, kb, km, kv = jax.random.split(k, 4)
        g, b = uni(kg, (c,), 0.8, 1.2), nrm(kb, (c,), 0.05)
        m, v = nrm(km, (c,), 0.05), uni(kv, (c,), 0.5, 1.5)
        scale = g / np.sqrt(v + eps)
        return scale, b - m * scale

    # conv1 (F1,1,1,K), bias-free + BN1 -> expanded im2col weight + per-row shift
    w1 = nrm(ks[0], (F1, K))
    s1, t1 = bn_fold(ks[1], F1, 1e-3)
    w1f = w1 * s1[:, None]
    w1e = np.zeros((F1CH, KCH), np.float32)
    for f in range(F1):
        for c in range(CH):
            for k in range(K):
                w1e[f * CH + c, k * CH + c] = w1f[f, k]
    b1r = np.repeat(t1, CH)

    # ECA (canonical, k=3 1-D conv over F1 maps, zero pad, no bias): GAP over (CH, T1)
    # + conv + group row-duplication (commutes with sigmoid) folded into one matrix
    wc = nrm(ks[2], (3,), 0.5)
    g1 = np.zeros((F1, F1CH), np.float32)
    for f in range(F1):
        g1[f, f * CH:(f + 1) * CH] = 1.0
    c3 = np.zeros((F1, F1), np.float32)
    for f in range(F1):
        if f > 0:
            c3[f, f - 1] = wc[0]
        c3[f, f] = wc[1]
        if f < F1 - 1:
            c3[f, f + 1] = wc[2]
    eg2 = np.zeros((F1D, F1), np.float32)
    for j in range(F1D):
        eg2[j, j // D] = 1.0
    weca = eg2 @ c3 @ g1 / float(CH * T1)

    # depthwise conv2 (F1D,1,CH,1), groups=F1, with bias + BN2
    w2 = nrm(ks[3], (F1D, CH))
    bc2 = nrm(ks[4], (F1D,), 0.05)
    s2, t2 = bn_fold(ks[5], F1D, 1e-3)
    w2d = np.zeros((F1D, F1CH), np.float32)
    for j in range(F1D):
        w2d[j, (j // D) * CH:(j // D + 1) * CH] = w2[j]
    w2f = w2d * s2[:, None]
    b2f = s2 * bc2 + t2

    # SeparableConv2d (depthwise 1xK + 1x1 pointwise + sep.bn) + BN3, fused per tap k
    w3d = nrm(ks[6], (F1D, K))
    b3d = nrm(ks[7], (F1D,), 0.05)
    w3p = nrm(ks[8], (F2, F1D))
    b3p = nrm(ks[9], (F2,), 0.05)
    ss, ts = bn_fold(ks[10], F2, 1e-5)             # sep.bn (default eps)
    s3, t3 = bn_fold(ks[11], F2, 1e-3)             # BatchNorm2d3
    sc3 = s3 * ss
    w3pf = w3p * sc3[:, None]
    w3k = np.einsum('oj,jk->koj', w3pf, w3d)       # (K, F2, F1D)
    b3f = w3pf @ b3d + sc3 * b3p + s3 * ts + t3

    # conv4 (F2,F2,1,K2), bias-free + BN4, per tap k
    w4 = nrm(ks[12], (F2, F2, K2))
    s4, t4 = bn_fold(ks[13], F2, 1e-3)
    w4k = np.transpose(w4, (2, 0, 1)) * s4[None, :, None]      # (K2, F2, F2)

    # fc (NC, F2*T4P) with AvgPool(1,8) folded: mfc[o, c, t] = fcw[o, c*T4P + t//8] / 8
    fcw = nrm(ks[14], (NC, F2 * T4P))
    fcb = nrm(ks[15], (NC,), 0.05)
    mfc = np.repeat(fcw.reshape(NC, F2, T4P), T4 // T4P, axis=2) / float(T4 // T4P)

    # pack into two bf16 weight slabs + one f32 bias block
    wa = np.zeros((WA_ROWS, KCH), np.float32)
    wa[WA_W1E:WA_W1E + F1CH] = w1e
    wa[WA_W2F:WA_W2F + F1D] = w2f
    wa[WA_ECA:WA_ECA + F1D] = weca
    wb = np.zeros((WB_ROWS, F2), np.float32)
    wb[WB_W3:WB_W3 + K * F2] = w3k.reshape(K * F2, F1D)
    wb[WB_W4:WB_W4 + K2 * F2] = w4k.reshape(K2 * F2, F2)
    bias = np.zeros((F1CH, NBIAS), np.float32)
    bias[:, 0] = b1r
    bias[0:F1D, 1] = b2f
    bias[0:F2, 2] = b3f
    bias[0:F2, 3] = t4                              # conv4 has no bias; BN4 shift only
    bias[0:NC, 4] = fcb
    return (jnp.asarray(wa, jnp.bfloat16), jnp.asarray(wb, jnp.bfloat16),
            jnp.asarray(bias, jnp.float32), mfc.astype(np.float32))


if __name__ == "__main__":
    key = jax.random.PRNGKey(0)
    kx, kp = jax.random.split(key)
    x = jax.random.normal(kx, (N, 1, CH, S), dtype=jnp.float32)     # NCHW like PyTorch
    params = make_params(kp)

    out = amcnn_forward(x, params, num_blocks=2)
    out = jax.block_until_ready(out)

    o = np.asarray(out)
    assert o.shape == (N, NC), o.shape
    assert np.all(np.isfinite(o))
    assert np.allclose(o.sum(axis=1), 1.0, atol=1e-3), o.sum(axis=1)
    print("KERNEL_OK")
</pallas_src>

<mosaic_0001>
module attributes {stable_mosaic.version = 11 : i64} {
  func.func @_amcnn_kernel(%arg0: i32, %arg1: memref<1x32x512xbf16, #tpu.memory_space<vmem>>, %arg2: memref<64x32xbf16, #tpu.memory_space<vmem>>, %arg3: memref<192x16xbf16, #tpu.memory_space<vmem>>, %arg4: memref<512x258xbf16, #tpu.memory_space<vmem>>, %arg5: memref<320x256xbf16, #tpu.memory_space<vmem>>, %arg6: memref<2x512xf32, #tpu.memory_space<vmem>>, %arg7: memref<32x8xf32, #tpu.memory_space<vmem>>, %arg8: memref<256x2xf32, #tpu.memory_space<vmem>>, %arg9: memref<1x4x2xf32, #tpu.memory_space<vmem>>) attributes {dimension_semantics = [#tpu.dimension_semantics<parallel>], iteration_bounds = array<i64: 2>, scalar_prefetch = 0 : i64, scratch_operands = 0 : i64, tpu.core_type = #tpu.core_type<tc>, window_params = [{transform_indices = @transform_0, window_bounds = array<i64: 1, 32, 512>}, {pipeline_mode = #tpu.pipeline_mode<synchronous>, transform_indices = @transform_1, window_bounds = array<i64: 64, 32>}, {pipeline_mode = #tpu.pipeline_mode<synchronous>, transform_indices = @transform_2, window_bounds = array<i64: 192, 16>}, {pipeline_mode = #tpu.pipeline_mode<synchronous>, transform_indices = @transform_3, window_bounds = array<i64: 512, 258>}, {pipeline_mode = #tpu.pipeline_mode<synchronous>, transform_indices = @transform_4, window_bounds = array<i64: 320, 256>}, {pipeline_mode = #tpu.pipeline_mode<synchronous>, transform_indices = @transform_5, window_bounds = array<i64: 2, 512>}, {pipeline_mode = #tpu.pipeline_mode<synchronous>, transform_indices = @transform_6, window_bounds = array<i64: 32, 8>}, {pipeline_mode = #tpu.pipeline_mode<synchronous>, transform_indices = @transform_7, window_bounds = array<i64: 256, 2>}, {transform_indices = @transform_8, window_bounds = array<i64: 1, 4, 2>}]} {
    %c0 = arith.constant 0 : index
    %c0_0 = arith.constant 0 : index
    %0 = vector.load %arg2[%c0, %c0_0] : memref<64x32xbf16, #tpu.memory_space<vmem>>, vector<32x32xbf16>
    %c32 = arith.constant 32 : index
    %c0_1 = arith.constant 0 : index
    %1 = vector.load %arg2[%c32, %c0_1] : memref<64x32xbf16, #tpu.memory_space<vmem>>, vector<16x32xbf16>
    %c48 = arith.constant 48 : index
    %c0_2 = arith.constant 0 : index
    %2 = vector.load %arg2[%c48, %c0_2] : memref<64x32xbf16, #tpu.memory_space<vmem>>, vector<16x32xbf16>
    %c0_3 = arith.constant 0 : index
    %c0_4 = arith.constant 0 : index
    %3 = vector.load %arg7[%c0_3, %c0_4] : memref<32x8xf32, #tpu.memory_space<vmem>>, vector<32x1xf32>
    %c0_5 = arith.constant 0 : index
    %c1 = arith.constant 1 : index
    %4 = vector.load %arg7[%c0_5, %c1] : memref<32x8xf32, #tpu.memory_space<vmem>>, vector<16x1xf32>
    %c0_6 = arith.constant 0 : index
    %c2 = arith.constant 2 : index
    %5 = vector.load %arg7[%c0_6, %c2] : memref<32x8xf32, #tpu.memory_space<vmem>>, vector<16x1xf32>
    %c0_7 = arith.constant 0 : index
    %c3 = arith.constant 3 : index
    %6 = vector.load %arg7[%c0_7, %c3] : memref<32x8xf32, #tpu.memory_space<vmem>>, vector<16x1xf32>
    %c0_8 = arith.constant 0 : index
    %c4 = arith.constant 4 : index
    %7 = vector.load %arg7[%c0_8, %c4] : memref<32x8xf32, #tpu.memory_space<vmem>>, vector<4x1xf32>
    %c0_9 = arith.constant 0 : index
    %c0_10 = arith.constant 0 : index
    %c0_11 = arith.constant 0 : index
    %8 = vector.load %arg1[%c0_9, %c0_10, %c0_11] : memref<1x32x512xbf16, #tpu.memory_space<vmem>>, vector<1x32x512xbf16>
    %9 = vector.shape_cast %8 : vector<1x32x512xbf16> to vector<32x512xbf16>
    %cst = arith.constant dense<0.000000e+00> : vector<32x512xf32>
    %10 = tpu.matmul %0, %9, %cst {dimension_numbers = #tpu.dot_dimension_numbers<[1], [0], [0], [1], [0, 0, 1, 1], [], []>} : vector<32x32xbf16>, vector<32x512xbf16>, vector<32x512xf32> -> vector<32x512xf32>
    %11 = vector.broadcast %3 : vector<32x1xf32> to vector<32x512xf32>
    %12 = arith.addf %10, %11 : vector<32x512xf32>
    %13 = arith.truncf %12 : vector<32x512xf32> to vector<32x512xbf16>
    %c0_12 = arith.constant 0 : index
    %c256 = arith.constant 256 : index
    %14 = vector.load %arg4[%c0_12, %c256] : memref<512x258xbf16, #tpu.memory_space<vmem>>, vector<512x2xbf16>
    %cst_13 = arith.constant dense<0.000000e+00> : vector<32x2xf32>
    %15 = tpu.matmul %13, %14, %cst_13 {dimension_numbers = #tpu.dot_dimension_numbers<[1], [0], [0], [1], [0, 0, 1, 1], [], []>} : vector<32x512xbf16>, vector<512x2xbf16>, vector<32x2xf32> -> vector<32x2xf32>
    %16 = arith.truncf %15 : vector<32x2xf32> to vector<32x2xbf16>
    %cst_14 = arith.constant dense<0.000000e+00> : vector<16x2xf32>
    %17 = tpu.matmul %2, %16, %cst_14 {dimension_numbers = #tpu.dot_dimension_numbers<[1], [0], [0], [1], [0, 0, 1, 1], [], []>} : vector<16x32xbf16>, vector<32x2xbf16>, vector<16x2xf32> -> vector<16x2xf32>
    %cst_15 = arith.constant 0.000000e+00 : f32
    %18 = vector.broadcast %cst_15 : f32 to vector<16x2xf32>
    %19 = arith.subf %18, %17 : vector<16x2xf32>
    %20 = math.exp %19 : vector<16x2xf32>
    %cst_16 = arith.constant 1.000000e+00 : f32
    %21 = vector.broadcast %cst_16 : f32 to vector<16x2xf32>
    %22 = arith.addf %21, %20 : vector<16x2xf32>
    %cst_17 = arith.constant 1.000000e+00 : f32
    %23 = vector.broadcast %cst_17 : f32 to vector<16x2xf32>
    %24 = arith.divf %23, %22 : vector<16x2xf32>
    %c0_18 = arith.constant 0 : index
    %c0_19 = arith.constant 0 : index
    %25 = vector.load %arg6[%c0_18, %c0_19] : memref<2x512xf32, #tpu.memory_space<vmem>>, vector<2x512xf32>
    %cst_20 = arith.constant dense<0.000000e+00> : vector<16x512xf32>
    %26 = tpu.matmul %24, %25, %cst_20 {dimension_numbers = #tpu.dot_dimension_numbers<[1], [0], [0], [1], [0, 0, 1, 1], [], []>} : vector<16x2xf32>, vector<2x512xf32>, vector<16x512xf32> -> vector<16x512xf32>
    %cst_21 = arith.constant dense<0.000000e+00> : vector<16x512xf32>
    %27 = tpu.matmul %1, %13, %cst_21 {dimension_numbers = #tpu.dot_dimension_numbers<[1], [0], [0], [1], [0, 0, 1, 1], [], []>} : vector<16x32xbf16>, vector<32x512xbf16>, vector<16x512xf32> -> vector<16x512xf32>
    %28 = arith.mulf %27, %26 : vector<16x512xf32>
    %29 = vector.broadcast %4 : vector<16x1xf32> to vector<16x512xf32>
    %30 = arith.addf %28, %29 : vector<16x512xf32>
    %31 = math.absf %30 : vector<16x512xf32>
    %cst_22 = arith.constant 0.000000e+00 : f32
    %32 = vector.broadcast %cst_22 : f32 to vector<16x512xf32>
    %33 = arith.subf %32, %31 : vector<16x512xf32>
    %34 = math.exp %33 : vector<16x512xf32>
    %cst_23 = arith.constant 0.000000e+00 : f32
    %35 = vector.broadcast %cst_23 : f32 to vector<16x512xf32>
    %36 = arith.cmpf oge, %30, %35 : vector<16x512xf32>
    %cst_24 = arith.constant 1.000000e+00 : f32
    %37 = vector.broadcast %cst_24 : f32 to vector<16x512xf32>
    %38 = arith.subf %37, %34 : vector<16x512xf32>
    %cst_25 = arith.constant 1.000000e+00 : f32
    %39 = vector.broadcast %cst_25 : f32 to vector<16x512xf32>
    %40 = arith.subf %34, %39 : vector<16x512xf32>
    %41 = arith.select %36, %38, %40 : vector<16x512xi1>, vector<16x512xf32>
    %42 = arith.truncf %41 : vector<16x512xf32> to vector<16x512xbf16>
    %c0_26 = arith.constant 0 : index
    %c0_27 = arith.constant 0 : index
    %43 = vector.load %arg4[%c0_26, %c0_27] : memref<512x258xbf16, #tpu.memory_space<vmem>>, vector<512x256xbf16>
    %cst_28 = arith.constant dense<0.000000e+00> : vector<16x256xf32>
    %44 = tpu.matmul %42, %43, %cst_28 {dimension_numbers = #tpu.dot_dimension_numbers<[1], [0], [0], [1], [0, 0, 1, 1], [], []>} : vector<16x512xbf16>, vector<512x256xbf16>, vector<16x256xf32> -> vector<16x256xf32>
    %c0_29 = arith.constant 0 : index
    %c0_30 = arith.constant 0 : index
    %45 = vector.load %arg3[%c0_29, %c0_30] : memref<192x16xbf16, #tpu.memory_space<vmem>>, vector<16x16xbf16>
    %46 = arith.truncf %44 : vector<16x256xf32> to vector<16x256xbf16>
    %cst_31 = arith.constant dense<0.000000e+00> : vector<16x256xf32>
    %47 = tpu.matmul %45, %46, %cst_31 {dimension_numbers = #tpu.dot_dimension_numbers<[1], [0], [0], [1], [0, 0, 1, 1], [], []>} : vector<16x16xbf16>, vector<16x256xbf16>, vector<16x256xf32> -> vector<16x256xf32>
    %c255_i32 = arith.constant 255 : i32
    %48 = tpu.dynamic_rotate %44 by %c255_i32 dim 1 : vector<16x256xf32>, i32 -> vector<16x256xf32>
    %49 = arith.truncf %48 : vector<16x256xf32> to vector<16x256xbf16>
    %c16 = arith.constant 16 : index
    %c0_32 = arith.constant 0 : index
    %50 = vector.load %arg3[%c16, %c0_32] : memref<192x16xbf16, #tpu.memory_space<vmem>>, vector<16x16xbf16>
    %cst_33 = arith.constant dense<0.000000e+00> : vector<16x256xf32>
    %51 = tpu.matmul %50, %49, %cst_33 {dimension_numbers = #tpu.dot_dimension_numbers<[1], [0], [0], [1], [0, 0, 1, 1], [], []>} : vector<16x16xbf16>, vector<16x256xbf16>, vector<16x256xf32> -> vector<16x256xf32>
    %52 = arith.addf %47, %51 : vector<16x256xf32>
    %c254_i32 = arith.constant 254 : i32
    %53 = tpu.dynamic_rotate %44 by %c254_i32 dim 1 : vector<16x256xf32>, i32 -> vector<16x256xf32>
    %54 = arith.truncf %53 : vector<16x256xf32> to vector<16x256xbf16>
    %c32_34 = arith.constant 32 : index
    %c0_35 = arith.constant 0 : index
    %55 = vector.load %arg3[%c32_34, %c0_35] : memref<192x16xbf16, #tpu.memory_space<vmem>>, vector<16x16xbf16>
    %cst_36 = arith.constant dense<0.000000e+00> : vector<16x256xf32>
    %56 = tpu.matmul %55, %54, %cst_36 {dimension_numbers = #tpu.dot_dimension_numbers<[1], [0], [0], [1], [0, 0, 1, 1], [], []>} : vector<16x16xbf16>, vector<16x256xbf16>, vector<16x256xf32> -> vector<16x256xf32>
    %57 = arith.addf %52, %56 : vector<16x256xf32>
    %c253_i32 = arith.constant 253 : i32
    %58 = tpu.dynamic_rotate %44 by %c253_i32 dim 1 : vector<16x256xf32>, i32 -> vector<16x256xf32>
    %59 = arith.truncf %58 : vector<16x256xf32> to vector<16x256xbf16>
    %c48_37 = arith.constant 48 : index
    %c0_38 = arith.constant 0 : index
    %60 = vector.load %arg3[%c48_37, %c0_38] : memref<192x16xbf16, #tpu.memory_space<vmem>>, vector<16x16xbf16>
    %cst_39 = arith.constant dense<0.000000e+00> : vector<16x256xf32>
    %61 = tpu.matmul %60, %59, %cst_39 {dimension_numbers = #tpu.dot_dimension_numbers<[1], [0], [0], [1], [0, 0, 1, 1], [], []>} : vector<16x16xbf16>, vector<16x256xbf16>, vector<16x256xf32> -> vector<16x256xf32>
    %62 = arith.addf %57, %61 : vector<16x256xf32>
    %c252_i32 = arith.constant 252 : i32
    %63 = tpu.dynamic_rotate %44 by %c252_i32 dim 1 : vector<16x256xf32>, i32 -> vector<16x256xf32>
    %64 = arith.truncf %63 : vector<16x256xf32> to vector<16x256xbf16>
    %c64 = arith.constant 64 : index
    %c0_40 = arith.constant 0 : index
    %65 = vector.load %arg3[%c64, %c0_40] : memref<192x16xbf16, #tpu.memory_space<vmem>>, vector<16x16xbf16>
    %cst_41 = arith.constant dense<0.000000e+00> : vector<16x256xf32>
    %66 = tpu.matmul %65, %64, %cst_41 {dimension_numbers = #tpu.dot_dimension_numbers<[1], [0], [0], [1], [0, 0, 1, 1], [], []>} : vector<16x16xbf16>, vector<16x256xbf16>, vector<16x256xf32> -> vector<16x256xf32>
    %67 = arith.addf %62, %66 : vector<16x256xf32>
    %c251_i32 = arith.constant 251 : i32
    %68 = tpu.dynamic_rotate %44 by %c251_i32 dim 1 : vector<16x256xf32>, i32 -> vector<16x256xf32>
    %69 = arith.truncf %68 : vector<16x256xf32> to vector<16x256xbf16>
    %c80 = arith.constant 80 : index
    %c0_42 = arith.constant 0 : index
    %70 = vector.load %arg3[%c80, %c0_42] : memref<192x16xbf16, #tpu.memory_space<vmem>>, vector<16x16xbf16>
    %cst_43 = arith.constant dense<0.000000e+00> : vector<16x256xf32>
    %71 = tpu.matmul %70, %69, %cst_43 {dimension_numbers = #tpu.dot_dimension_numbers<[1], [0], [0], [1], [0, 0, 1, 1], [], []>} : vector<16x16xbf16>, vector<16x256xbf16>, vector<16x256xf32> -> vector<16x256xf32>
    %72 = arith.addf %67, %71 : vector<16x256xf32>
    %c250_i32 = arith.constant 250 : i32
    %73 = tpu.dynamic_rotate %44 by %c250_i32 dim 1 : vector<16x256xf32>, i32 -> vector<16x256xf32>
    %74 = arith.truncf %73 : vector<16x256xf32> to vector<16x256xbf16>
    %c96 = arith.constant 96 : index
    %c0_44 = arith.constant 0 : index
    %75 = vector.load %arg3[%c96, %c0_44] : memref<192x16xbf16, #tpu.memory_space<vmem>>, vector<16x16xbf16>
    %cst_45 = arith.constant dense<0.000000e+00> : vector<16x256xf32>
    %76 = tpu.matmul %75, %74, %cst_45 {dimension_numbers = #tpu.dot_dimension_numbers<[1], [0], [0], [1], [0, 0, 1, 1], [], []>} : vector<16x16xbf16>, vector<16x256xbf16>, vector<16x256xf32> -> vector<16x256xf32>
    %77 = arith.addf %72, %76 : vector<16x256xf32>
    %c249_i32 = arith.constant 249 : i32
    %78 = tpu.dynamic_rotate %44 by %c249_i32 dim 1 : vector<16x256xf32>, i32 -> vector<16x256xf32>
    %79 = arith.truncf %78 : vector<16x256xf32> to vector<16x256xbf16>
    %c112 = arith.constant 112 : index
    %c0_46 = arith.constant 0 : index
    %80 = vector.load %arg3[%c112, %c0_46] : memref<192x16xbf16, #tpu.memory_space<vmem>>, vector<16x16xbf16>
    %cst_47 = arith.constant dense<0.000000e+00> : vector<16x256xf32>
    %81 = tpu.matmul %80, %79, %cst_47 {dimension_numbers = #tpu.dot_dimension_numbers<[1], [0], [0], [1], [0, 0, 1, 1], [], []>} : vector<16x16xbf16>, vector<16x256xbf16>, vector<16x256xf32> -> vector<16x256xf32>
    %82 = arith.addf %77, %81 : vector<16x256xf32>
    %83 = vector.broadcast %5 : vector<16x1xf32> to vector<16x256xf32>
    %84 = arith.addf %82, %83 : vector<16x256xf32>
    %85 = math.absf %84 : vector<16x256xf32>
    %cst_48 = arith.constant 0.000000e+00 : f32
    %86 = vector.broadcast %cst_48 : f32 to vector<16x256xf32>
    %87 = arith.subf %86, %85 : vector<16x256xf32>
    %88 = math.exp %87 : vector<16x256xf32>
    %cst_49 = arith.constant 0.000000e+00 : f32
    %89 = vector.broadcast %cst_49 : f32 to vector<16x256xf32>
    %90 = arith.cmpf oge, %84, %89 : vector<16x256xf32>
    %cst_50 = arith.constant 1.000000e+00 : f32
    %91 = vector.broadcast %cst_50 : f32 to vector<16x256xf32>
    %92 = arith.subf %91, %88 : vector<16x256xf32>
    %cst_51 = arith.constant 1.000000e+00 : f32
    %93 = vector.broadcast %cst_51 : f32 to vector<16x256xf32>
    %94 = arith.subf %88, %93 : vector<16x256xf32>
    %95 = arith.select %90, %92, %94 : vector<16x256xi1>, vector<16x256xf32>
    %96 = arith.truncf %95 : vector<16x256xf32> to vector<16x256xbf16>
    %c0_52 = arith.constant 0 : index
    %c0_53 = arith.constant 0 : index
    %97 = vector.load %arg5[%c0_52, %c0_53] : memref<320x256xbf16, #tpu.memory_space<vmem>>, vector<256x256xbf16>
    %cst_54 = arith.constant dense<0.000000e+00> : vector<16x256xf32>
    %98 = tpu.matmul %96, %97, %cst_54 {dimension_numbers = #tpu.dot_dimension_numbers<[1], [0], [0], [1], [0, 0, 1, 1], [], []>} : vector<16x256xbf16>, vector<256x256xbf16>, vector<16x256xf32> -> vector<16x256xf32>
    %c128 = arith.constant 128 : index
    %c0_55 = arith.constant 0 : index
    %99 = vector.load %arg3[%c128, %c0_55] : memref<192x16xbf16, #tpu.memory_space<vmem>>, vector<16x16xbf16>
    %100 = arith.truncf %98 : vector<16x256xf32> to vector<16x256xbf16>
    %cst_56 = arith.constant dense<0.000000e+00> : vector<16x256xf32>
    %101 = tpu.matmul %99, %100, %cst_56 {dimension_numbers = #tpu.dot_dimension_numbers<[1], [0], [0], [1], [0, 0, 1, 1], [], []>} : vector<16x16xbf16>, vector<16x256xbf16>, vector<16x256xf32> -> vector<16x256xf32>
    %c255_i32_57 = arith.constant 255 : i32
    %102 = tpu.dynamic_rotate %98 by %c255_i32_57 dim 1 : vector<16x256xf32>, i32 -> vector<16x256xf32>
    %103 = arith.truncf %102 : vector<16x256xf32> to vector<16x256xbf16>
    %c144 = arith.constant 144 : index
    %c0_58 = arith.constant 0 : index
    %104 = vector.load %arg3[%c144, %c0_58] : memref<192x16xbf16, #tpu.memory_space<vmem>>, vector<16x16xbf16>
    %cst_59 = arith.constant dense<0.000000e+00> : vector<16x256xf32>
    %105 = tpu.matmul %104, %103, %cst_59 {dimension_numbers = #tpu.dot_dimension_numbers<[1], [0], [0], [1], [0, 0, 1, 1], [], []>} : vector<16x16xbf16>, vector<16x256xbf16>, vector<16x256xf32> -> vector<16x256xf32>
    %106 = arith.addf %101, %105 : vector<16x256xf32>
    %c254_i32_60 = arith.constant 254 : i32
    %107 = tpu.dynamic_rotate %98 by %c254_i32_60 dim 1 : vector<16x256xf32>, i32 -> vector<16x256xf32>
    %108 = arith.truncf %107 : vector<16x256xf32> to vector<16x256xbf16>
    %c160 = arith.constant 160 : index
    %c0_61 = arith.constant 0 : index
    %109 = vector.load %arg3[%c160, %c0_61] : memref<192x16xbf16, #tpu.memory_space<vmem>>, vector<16x16xbf16>
    %cst_62 = arith.constant dense<0.000000e+00> : vector<16x256xf32>
    %110 = tpu.matmul %109, %108, %cst_62 {dimension_numbers = #tpu.dot_dimension_numbers<[1], [0], [0], [1], [0, 0, 1, 1], [], []>} : vector<16x16xbf16>, vector<16x256xbf16>, vector<16x256xf32> -> vector<16x256xf32>
    %111 = arith.addf %106, %110 : vector<16x256xf32>
    %c253_i32_63 = arith.constant 253 : i32
    %112 = tpu.dynamic_rotate %98 by %c253_i32_63 dim 1 : vector<16x256xf32>, i32 -> vector<16x256xf32>
    %113 = arith.truncf %112 : vector<16x256xf32> to vector<16x256xbf16>
    %c176 = arith.constant 176 : index
    %c0_64 = arith.constant 0 : index
    %114 = vector.load %arg3[%c176, %c0_64] : memref<192x16xbf16, #tpu.memory_space<vmem>>, vector<16x16xbf16>
    %cst_65 = arith.constant dense<0.000000e+00> : vector<16x256xf32>
    %115 = tpu.matmul %114, %113, %cst_65 {dimension_numbers = #tpu.dot_dimension_numbers<[1], [0], [0], [1], [0, 0, 1, 1], [], []>} : vector<16x16xbf16>, vector<16x256xbf16>, vector<16x256xf32> -> vector<16x256xf32>
    %116 = arith.addf %111, %115 : vector<16x256xf32>
    %117 = vector.broadcast %6 : vector<16x1xf32> to vector<16x256xf32>
    %118 = arith.addf %116, %117 : vector<16x256xf32>
    %119 = math.absf %118 : vector<16x256xf32>
    %cst_66 = arith.constant 0.000000e+00 : f32
    %120 = vector.broadcast %cst_66 : f32 to vector<16x256xf32>
    %121 = arith.subf %120, %119 : vector<16x256xf32>
    %122 = math.exp %121 : vector<16x256xf32>
    %cst_67 = arith.constant 0.000000e+00 : f32
    %123 = vector.broadcast %cst_67 : f32 to vector<16x256xf32>
    %124 = arith.cmpf oge, %118, %123 : vector<16x256xf32>
    %cst_68 = arith.constant 1.000000e+00 : f32
    %125 = vector.broadcast %cst_68 : f32 to vector<16x256xf32>
    %126 = arith.subf %125, %122 : vector<16x256xf32>
    %cst_69 = arith.constant 1.000000e+00 : f32
    %127 = vector.broadcast %cst_69 : f32 to vector<16x256xf32>
    %128 = arith.subf %122, %127 : vector<16x256xf32>
    %129 = arith.select %124, %126, %128 : vector<16x256xi1>, vector<16x256xf32>
    %c256_70 = arith.constant 256 : index
    %c0_71 = arith.constant 0 : index
    %130 = vector.load %arg5[%c256_70, %c0_71] : memref<320x256xbf16, #tpu.memory_space<vmem>>, vector<16x256xbf16>
    %131 = arith.extf %130 : vector<16x256xbf16> to vector<16x256xf32>
    %132 = arith.mulf %129, %131 : vector<16x256xf32>
    %cst_72 = arith.constant dense<0.000000e+00> : vector<256xf32>
    %133 = vector.multi_reduction <add>, %132, %cst_72 [0] : vector<16x256xf32> to vector<256xf32>
    %134 = vector.shape_cast %133 : vector<256xf32> to vector<1x256xf32>
    %c272 = arith.constant 272 : index
    %c0_73 = arith.constant 0 : index
    %135 = vector.load %arg5[%c272, %c0_73] : memref<320x256xbf16, #tpu.memory_space<vmem>>, vector<16x256xbf16>
    %136 = arith.extf %135 : vector<16x256xbf16> to vector<16x256xf32>
    %137 = arith.mulf %129, %136 : vector<16x256xf32>
    %cst_74 = arith.constant dense<0.000000e+00> : vector<256xf32>
    %138 = vector.multi_reduction <add>, %137, %cst_74 [0] : vector<16x256xf32> to vector<256xf32>
    %139 = vector.shape_cast %138 : vector<256xf32> to vector<1x256xf32>
    %c288 = arith.constant 288 : index
    %c0_75 = arith.constant 0 : index
    %140 = vector.load %arg5[%c288, %c0_75] : memref<320x256xbf16, #tpu.memory_space<vmem>>, vector<16x256xbf16>
    %141 = arith.extf %140 : vector<16x256xbf16> to vector<16x256xf32>
    %142 = arith.mulf %129, %141 : vector<16x256xf32>
    %cst_76 = arith.constant dense<0.000000e+00> : vector<256xf32>
    %143 = vector.multi_reduction <add>, %142, %cst_76 [0] : vector<16x256xf32> to vector<256xf32>
    %144 = vector.shape_cast %143 : vector<256xf32> to vector<1x256xf32>
    %c304 = arith.constant 304 : index
    %c0_77 = arith.constant 0 : index
    %145 = vector.load %arg5[%c304, %c0_77] : memref<320x256xbf16, #tpu.memory_space<vmem>>, vector<16x256xbf16>
    %146 = arith.extf %145 : vector<16x256xbf16> to vector<16x256xf32>
    %147 = arith.mulf %129, %146 : vector<16x256xf32>
    %cst_78 = arith.constant dense<0.000000e+00> : vector<256xf32>
    %148 = vector.multi_reduction <add>, %147, %cst_78 [0] : vector<16x256xf32> to vector<256xf32>
    %149 = vector.shape_cast %148 : vector<256xf32> to vector<1x256xf32>
    %150 = tpu.concatenate %134, %139, %144, %149 in 0 : vector<1x256xf32>, vector<1x256xf32>, vector<1x256xf32>, vector<1x256xf32> -> vector<4x256xf32>
    %c0_79 = arith.constant 0 : index
    %c0_80 = arith.constant 0 : index
    %151 = vector.load %arg8[%c0_79, %c0_80] : memref<256x2xf32, #tpu.memory_space<vmem>>, vector<256x2xf32>
    %cst_81 = arith.constant dense<0.000000e+00> : vector<4x2xf32>
    %152 = tpu.matmul %150, %151, %cst_81 {dimension_numbers = #tpu.dot_dimension_numbers<[1], [0], [0], [1], [0, 0, 1, 1], [], []>} : vector<4x256xf32>, vector<256x2xf32>, vector<4x2xf32> -> vector<4x2xf32>
    %153 = vector.broadcast %7 : vector<4x1xf32> to vector<4x2xf32>
    %154 = arith.addf %152, %153 : vector<4x2xf32>
    %cst_82 = arith.constant dense<0xFF800000> : vector<2xf32>
    %155 = vector.multi_reduction <maximumf>, %154, %cst_82 [0] : vector<4x2xf32> to vector<2xf32>
    %156 = vector.shape_cast %155 : vector<2xf32> to vector<1x2xf32>
    %157 = vector.broadcast %156 : vector<1x2xf32> to vector<4x2xf32>
    %158 = arith.subf %154, %157 : vector<4x2xf32>
    %159 = math.exp %158 : vector<4x2xf32>
    %cst_83 = arith.constant dense<0.000000e+00> : vector<2xf32>
    %160 = vector.multi_reduction <add>, %159, %cst_83 [0] : vector<4x2xf32> to vector<2xf32>
    %161 = vector.shape_cast %160 : vector<2xf32> to vector<1x2xf32>
    %162 = vector.broadcast %161 : vector<1x2xf32> to vector<4x2xf32>
    %163 = arith.divf %159, %162 : vector<4x2xf32>
    %c0_84 = arith.constant 0 : index
    %c0_85 = arith.constant 0 : index
    %c0_86 = arith.constant 0 : index
    %164 = vector.load %arg9[%c0_84, %c0_85, %c0_86] : memref<1x4x2xf32, #tpu.memory_space<vmem>>, vector<1x4x2xf32>
    %165 = vector.shape_cast %164 : vector<1x4x2xf32> to vector<4x2xf32>
    %166 = vector.shape_cast %163 : vector<4x2xf32> to vector<1x4x2xf32>
    tpu.vector_store %arg9[%c0_84, %c0_85, %c0_86], %166 {strides = array<i32>} : memref<1x4x2xf32, #tpu.memory_space<vmem>>, vector<1x4x2xf32>,
    return
  }
  func.func @transform_0(%arg0: i32) -> (i32, i32, i32) {
    %c0_i32 = arith.constant 0 : i32
    %c0_i32_0 = arith.constant 0 : i32
    %c0_i32_1 = arith.constant 0 : i32
    return %arg0, %c0_i32, %c0_i32_0 : i32, i32, i32
  }
  func.func @transform_1(%arg0: i32) -> (i32, i32) {
    %c0_i32 = arith.constant 0 : i32
    %c0_i32_0 = arith.constant 0 : i32
    %c0_i32_1 = arith.constant 0 : i32
    return %c0_i32, %c0_i32_0 : i32, i32
  }
  func.func @transform_2(%arg0: i32) -> (i32, i32) {
    %c0_i32 = arith.constant 0 : i32
    %c0_i32_0 = arith.constant 0 : i32
    %c0_i32_1 = arith.constant 0 : i32
    return %c0_i32, %c0_i32_0 : i32, i32
  }
  func.func @transform_3(%arg0: i32) -> (i32, i32) {
    %c0_i32 = arith.constant 0 : i32
    %c0_i32_0 = arith.constant 0 : i32
    %c0_i32_1 = arith.constant 0 : i32
    return %c0_i32, %c0_i32_0 : i32, i32
  }
  func.func @transform_4(%arg0: i32) -> (i32, i32) {
    %c0_i32 = arith.constant 0 : i32
    %c0_i32_0 = arith.constant 0 : i32
    %c0_i32_1 = arith.constant 0 : i32
    return %c0_i32, %c0_i32_0 : i32, i32
  }
  func.func @transform_5(%arg0: i32) -> (i32, i32) {
    %c0_i32 = arith.constant 0 : i32
    %c0_i32_0 = arith.constant 0 : i32
    %c0_i32_1 = arith.constant 0 : i32
    return %c0_i32, %c0_i32_0 : i32, i32
  }
  func.func @transform_6(%arg0: i32) -> (i32, i32) {
    %c0_i32 = arith.constant 0 : i32
    %c0_i32_0 = arith.constant 0 : i32
    %c0_i32_1 = arith.constant 0 : i32
    return %c0_i32, %c0_i32_0 : i32, i32
  }
  func.func @transform_7(%arg0: i32) -> (i32, i32) {
    %c0_i32 = arith.constant 0 : i32
    %c0_i32_0 = arith.constant 0 : i32
    %c0_i32_1 = arith.constant 0 : i32
    return %c0_i32, %c0_i32_0 : i32, i32
  }
  func.func @transform_8(%arg0: i32) -> (i32, i32, i32) {
    %c0_i32 = arith.constant 0 : i32
    %c0_i32_0 = arith.constant 0 : i32
    %c0_i32_1 = arith.constant 0 : i32
    return %arg0, %c0_i32, %c0_i32_0 : i32, i32, i32
  }
}

</mosaic_0001>

<bundles_post_ra>
// kernel: tpu_custom_call.1
= control target key start
LH: loop header
LB: loop body
LE: loop exit
PB: predicated region body
PF: predicated region fallthrough
CT: control target
= control target key end

     0   :  { %s3971_s27 = smov 0   ;;  %s4814_s0 = inlined_call_operand.vmem [shape: bf16[2,32,512], index: 0, kind: input, shape index: {}]   ;;  %s4815_s1 = inlined_call_operand.vmem [shape: bf16[64,32], index: 1, kind: input, shape index: {}]   ;;  %s4816_s2 = inlined_call_operand.vmem [shape: bf16[192,16], index: 2, kind: input, shape index: {}]   ;;  %s4817_s3 = inlined_call_operand.vmem [shape: bf16[512,258], index: 3, kind: input, shape index: {}]   ;;  %s4818_s4 = inlined_call_operand.vmem [shape: bf16[320,256], index: 4, kind: input, shape index: {}]   ;;  %s4819_s5 = inlined_call_operand.vmem [shape: f32[2,512], index: 5, kind: input, shape index: {}]   ;;  %s4820_s6 = inlined_call_operand.vmem [shape: f32[32,8], index: 6, kind: input, shape index: {}]   ;;  %s4821_s7 = inlined_call_operand.vmem [shape: f32[256,2], index: 7, kind: input, shape index: {}]   ;;  %s4822_s8 = inlined_call_operand.vmem [shape: f32[2,4,2], index: 8, kind: output, shape index: {}]  }
   0x1 LB: > { %s3211_s28 = sadd.s32 4294967295, %s3909_s27   ;;  %p3215_p0 = scmp.ge.s32.totalorder %s3909_s27, 1  ;;  %s3909_s27 = sphi %s3971_s27, %s18_s27  }
   0x2   : > { %p262_p1 = scmp.lt.s32.totalorder %s3909_s27, 3 }
   0x4   : > { %p263_p2 = pnand %p3215_p0, %p262_p1 }
   0x5   : > { %p295_p3 = scmp.lt.s32.totalorder (!%p263_p2), %s3211_s28, 1  ;;  %s3916_s21 = smov (!%p263_p2), 127  }
   0x6   : > { %266 = sbr.rel (%p263_p2) target bundleno = 2355 (0x933), region = 52  ;;  %s3917_s24 = smov (!%p263_p2), 126  }
   0x7   : > { %s3918_s25 = smov (!%p263_p2), 125   ;;  %s3919_s26 = smov (!%p263_p2), 124  }
   0x8   : > { %s3920_s29 = smov (!%p263_p2), 123   ;;  %s3921_s30 = smov (!%p263_p2), 122  }
   0x9   : > { %s3922_s9 = smov (!%p263_p2), 121  }
   0xb   : > { %v3911_v0 = vmov 0   ;;  %s4824_s28 = smov (!%p295_p3, %s3211_s28), 1  ;;  %v3987_v1 = vld [vmem:[%s4820_s6] sm:$0xff]  ;;  %v315_v2 = vld [vmem:[%s4820_s6 + $0x10] sm:$0xff]  ;;  %v3998_v3 = vld [vmem:[%s4820_s6 + $0x8] sm:$0xff]  ;;  %vm396_vm0 = vcmask 261120   ;;  %v940_v49 = vlaneseq }
   0xc   : > { %435 = vmatprep.mubr.bf16.mxu0 %v3911_v0  ;;  %488 = vmatprep.mubr.bf16.mxu1 %v3911_v0  ;;  %s3416_s11 = sshll.u32 %s4824_s28, 6  ;;  %v316_v4 = vld [vmem:[%s4820_s6 + $0x18] sm:$0xff]  ;;  %v3664_v15 = vld [vmem:[%s4815_s1] sm:$0xff]   ;;  %v3665_v22 = vld [vmem:[%s4815_s1 + $0x8] sm:$0xff]   ;;  %v3912_v47 = vmov 1983009808  }
   0xd   : > { %3542 = vset.pattern.permute.xlu0 %v3911_v0  ;;  %3543 = vset.pattern.permute.xlu1 %v3911_v0  ;;  %s299_s16 = scalar_lea.vmem %s4814_s0, %s3416_s11  ;;  %v3666_v10 = vld [vmem:[%s4817_s3 + $0x170] ss:$12 sps:$4 sm:$0xff]   ;;  %v3670_v18 = vld [vmem:[%s4817_s3 + $0x158] ss:$12 sps:$4 sm:$0xff]   ;;  %v3674_v23 = vld [vmem:[%s4817_s3 + $0x140] ss:$12 sps:$4 sm:$0xff]   ;;  %v938_v48 = vunpack.c.l.s4 %v3912_v47 }
   0xe   : > { %328 = vperm.xlu0 %3542, %v3987_v1   ;;  %338 = vperm.xlu1 %3543, %v315_v2   ;;  %v3652_v5 = vld [vmem:[%s299_s16 + $0x24] ss:$16 sps:$4 sm:$0xff]   ;;  %v3654_v6 = vld [vmem:[%s299_s16 + $0x2c] ss:$16 sps:$4 sm:$0xff]   ;;  %v3656_v7 = vld [vmem:[%s299_s16 + $0x20] ss:$16 sps:$4 sm:$0xff]  }
   0xf   : > { %415 = vmatprep.subr.bf16.mxu0 %v3652_v5  ;;  %v3657_v8 = vld [vmem:[%s299_s16 + $0x28] ss:$16 sps:$4 sm:$0xff]   ;;  %468 = vmatprep.subr.bf16.mxu1 %v3654_v6  ;;  %v3658_v9 = vld [vmem:[%s299_s16 + $0x4] ss:$16 sps:$4 sm:$0xff]   ;;  %v3667_v11 = vld [vmem:[%s4817_s3 + $0x2f0] ss:$12 sps:$4 sm:$0xff]   ;;  %v939_v50 = vunpack.c.0.s8 %v938_v48 }
  0x10   : > { %416 = vmatpush1.bf16.msra.mxu0 %v3656_v7  ;;  %469 = vmatpush1.bf16.msra.mxu1 %v3657_v8  ;;  %v3660_v12 = vld [vmem:[%s299_s16 + $0xc] ss:$16 sps:$4 sm:$0xff]   ;;  %v3662_v13 = vld [vmem:[%s299_s16] ss:$16 sps:$4 sm:$0xff]   ;;  %v3663_v14 = vld [vmem:[%s299_s16 + $0x8] ss:$16 sps:$4 sm:$0xff]  }
  0x11   : > { %417 = vmatprep.subr.bf16.mxu0 %v3658_v9  ;;  %470 = vmatprep.subr.bf16.mxu1 %v3660_v12  ;;  %v3668_v16 = vld [vmem:[%s4817_s3 + $0xb0] ss:$12 sps:$4 sm:$0xff]   ;;  %v3671_v19 = vld [vmem:[%s4817_s3 + $0x2d8] ss:$12 sps:$4 sm:$0xff]   ;;  %v3675_v24 = vld [vmem:[%s4817_s3 + $0x2c0] ss:$12 sps:$4 sm:$0xff]  }
  0x12   : > { %333 = vperm.xlu0 %3542, %v3998_v3   ;;  %343 = vperm.xlu1 %3543, %v316_v4   ;;  %v3669_v17 = vld [vmem:[%s4817_s3 + $0x230] ss:$12 sps:$4 sm:$0xff]   ;;  %v3672_v20 = vld [vmem:[%s4817_s3 + $0x98] ss:$12 sps:$4 sm:$0xff]   ;;  %v3676_v25 = vld [vmem:[%s4817_s3 + $0x80] ss:$12 sps:$4 sm:$0xff]  }
  0x13   : > { %v3673_v21 = vld [vmem:[%s4817_s3 + $0x218] ss:$12 sps:$4 sm:$0xff]   ;;  %v3677_v26 = vld [vmem:[%s4817_s3 + $0x200] ss:$12 sps:$4 sm:$0xff]   ;;  %v3678_v27 = vld [vmem:[%s4817_s3 + $0x128] ss:$12 sps:$4 sm:$0xff]  }
  0x14   : > { %418 = vmatpush1.bf16.msra.mxu0 %v3662_v13  ;;  %471 = vmatpush1.bf16.msra.mxu1 %v3663_v14  ;;  %v3679_v28 = vld [vmem:[%s4817_s3 + $0x2a8] ss:$12 sps:$4 sm:$0xff]   ;;  %v3682_v31 = vld [vmem:[%s4817_s3 + $0x110] ss:$12 sps:$4 sm:$0xff]   ;;  %v3686_v35 = vld [vmem:[%s4817_s3 + $0xf8] ss:$12 sps:$4 sm:$0xff]  }
  0x15   : > { %3417 = vmatprep.subr.bf16.mxu0 %v3666_v10  ;;  %3445 = vmatprep.subr.bf16.mxu1 %v3667_v11  ;;  %v3680_v29 = vld [vmem:[%s4817_s3 + $0x68] ss:$12 sps:$4 sm:$0xff]   ;;  %v3683_v32 = vld [vmem:[%s4817_s3 + $0x290] ss:$12 sps:$4 sm:$0xff]   ;;  %v3687_v36 = vld [vmem:[%s4817_s3 + $0x278] ss:$12 sps:$4 sm:$0xff]  }
  0x16   : > { %v3681_v30 = vld [vmem:[%s4817_s3 + $0x1e8] ss:$12 sps:$4 sm:$0xff]   ;;  %v3684_v33 = vld [vmem:[%s4817_s3 + $0x50] ss:$12 sps:$4 sm:$0xff]   ;;  %v3688_v37 = vld [vmem:[%s4817_s3 + $0x38] ss:$12 sps:$4 sm:$0xff]  }
  0x17   : > { %3229 = vmatmul.mubr.msk.bf16.vlgmr.msra.gmra.mxu0 %vm396_vm0, %v3664_v15  ;;  %3231 = vmatmul.mubr.msk.bf16.vlgmr.msra.gmra.mxu1 %vm396_vm0, %v3664_v15  ;;  %v3685_v34 = vld [vmem:[%s4817_s3 + $0x1d0] ss:$12 sps:$4 sm:$0xff]   ;;  %v3689_v38 = vld [vmem:[%s4817_s3 + $0x1b8] ss:$12 sps:$4 sm:$0xff]   ;;  %v3690_v39 = vld [vmem:[%s4817_s3 + $0xe0] ss:$12 sps:$4 sm:$0xff]  }
  0x18   : > { %445 = vmatprep.mubr.bf16.mxu0 %v3911_v0  ;;  %498 = vmatprep.mubr.bf16.mxu1 %v3911_v0  ;;  %v3691_v40 = vld [vmem:[%s4817_s3 + $0x260] ss:$12 sps:$4 sm:$0xff]   ;;  %v3694_v43 = vld [vmem:[%s4817_s3 + $0xc8] ss:$12 sps:$4 sm:$0xff]   ;;  %v941_v51 = vshrl.u32 %v940_v49, 7  ;;  %vm960_vm1 = vcmask 1041408  }
  0x19   : > { %3418 = vmatpush3.bf16.msra.mxu0 %v3668_v16  ;;  %3446 = vmatpush3.bf16.msra.mxu1 %v3669_v17  ;;  %v3692_v41 = vld [vmem:[%s4817_s3 + $0x20] ss:$12 sps:$4 sm:$0xff]   ;;  %v3695_v44 = vld [vmem:[%s4817_s3 + $0x248] ss:$12 sps:$4 sm:$0xff]   ;;  %vm3914_vm2 = vmmov 0   ;;  %vm953_vm3 = vcmask 15360  }
  0x1a   : > { %3419 = vmatprep.subr.bf16.mxu0 %v3670_v18  ;;  %3447 = vmatprep.subr.bf16.mxu1 %v3671_v19  ;;  %v3693_v42 = vld [vmem:[%s4817_s3 + $0x1a0] ss:$12 sps:$4 sm:$0xff]   ;;  %v3696_v45 = vld [vmem:[%s4817_s3 + $0x8] ss:$12 sps:$4 sm:$0xff]   ;;  %v4116_v52 = vsub.s32 %v939_v50, %v941_v51  ;;  %vm1807_vm12 = vcmask 130048   ;;  %s3218_s14 = sshll.u32 %s4824_s28, 2 }
  0x1b   : > { %v3697_v46 = vld [vmem:[%s4817_s3 + $0x188] ss:$12 sps:$4 sm:$0xff]   ;;  %v4121_v53 = vld [vmem:[%s4819_s5] sm:$0xff]  ;;  %s303_s17 = scalar_lea.vmem %s4822_s8, %s3218_s14 }
  0x1c   : > { %v943_v54 = vrot.slane %v4121_v53, %v4116_v52 }
  0x1d   : > { %3420 = vmatpush3.bf16.msra.mxu0 %v3672_v20  ;;  %3448 = vmatpush3.bf16.msra.mxu1 %v3673_v21 }
  0x1e   : > { %3421 = vmatprep.subr.bf16.mxu0 %v3674_v23  ;;  %3449 = vmatprep.subr.bf16.mxu1 %v3675_v24  ;;  %v951_v55 = vcombine.high %v943_v54, %v943_v54 }
  0x1f   : > { %3230 = vmatmul.mubr.msk.bf16.gmra.mxu0 %vm396_vm0, %v3665_v22  ;;  %3232 = vmatmul.mubr.msk.bf16.gmra.mxu1 %vm396_vm0, %v3665_v22 }
  0x21   : > { %3422 = vmatpush3.bf16.msra.mxu0 %v3676_v25  ;;  %3450 = vmatpush3.bf16.msra.mxu1 %v3677_v26 }
  0x22   : > { %3423 = vmatprep.subr.bf16.mxu0 %v3678_v27  ;;  %3451 = vmatprep.subr.bf16.mxu1 %v3679_v28 }
  0x25   : > { %3424 = vmatpush3.bf16.msra.mxu0 %v3680_v29  ;;  %3452 = vmatpush3.bf16.msra.mxu1 %v3681_v30 }
  0x26   : > { %3425 = vmatprep.subr.bf16.mxu0 %v3682_v31  ;;  %3453 = vmatprep.subr.bf16.mxu1 %v3683_v32 }
  0x29   : > { %3426 = vmatpush3.bf16.msra.mxu0 %v3684_v33  ;;  %3454 = vmatpush3.bf16.msra.mxu1 %v3685_v34 }
  0x2a   : > { %3427 = vmatprep.subr.bf16.mxu0 %v3686_v35  ;;  %3455 = vmatprep.subr.bf16.mxu1 %v3687_v36 }
  0x2d   : > { %3428 = vmatpush3.bf16.msra.mxu0 %v3688_v37  ;;  %3456 = vmatpush3.bf16.msra.mxu1 %v3689_v38 }
  0x2e   : > { %3429 = vmatprep.subr.bf16.mxu0 %v3690_v39  ;;  %3457 = vmatprep.subr.bf16.mxu1 %v3691_v40  ;;  %v3913_v39 = vmov 0.0  }
  0x31   : > { %3430 = vmatpush3.bf16.msra.mxu0 %v3692_v41  ;;  %3458 = vmatpush3.bf16.msra.mxu1 %v3693_v42 }
  0x32   : > { %3431 = vmatprep.subr.bf16.mxu0 %v3694_v43  ;;  %3459 = vmatprep.subr.bf16.mxu1 %v3695_v44 }
  0x35   : > { %3432 = vmatpush3.bf16.msra.mxu0 %v3696_v45  ;;  %3460 = vmatpush3.bf16.msra.mxu1 %v3697_v46 }
  0x36   : > { %3267 = vmatprep.subr.msk.mxu1 %vm960_vm1, %v951_v55  ;;  %3511 = vmatprep.subr.bf16.mxu0 %v3913_v39 }
  0x89   : > { %v329_v56 = vpop.permute.xlu0 %328  ;;  %v339_v9 = vpop.permute.xlu1 %338 }
  0x8d   : > { %v334_v63 = vpop.permute.xlu0 %333  ;;  %v344_v24 = vpop.permute.xlu1 %343 }
  0xd7   : > { %v437_v57 = vpop.f32.mrf.mxu0  ;;  %v490_v58 = vpop.f32.mrf.mxu1 }
  0xd8   : > { %v438_v12 = vadd.f32 %v437_v57, %v329_v56  ;;  %v491_v13 = vadd.f32 %v490_v58, %v329_v56 }
  0xd9   : > { %v439_v59 = vpop.f32.mrf.mxu0  ;;  %v492_v60 = vpop.f32.mrf.mxu1 }
  0xda   : > { %v440_v7 = vadd.f32 %v439_v59, %v329_v56  ;;  %v493_v8 = vadd.f32 %v492_v60, %v329_v56 }
  0xdb   : > { %v441_v61 = vpop.f32.mrf.mxu0  ;;  %v494_v62 = vpop.f32.mrf.mxu1 }
  0xdc   : > { %v442_v2 = vadd.f32 %v441_v61, %v334_v63  ;;  %v495_v4 = vadd.f32 %v494_v62, %v334_v63  ;;  %v936_v62 = vcombine.high %v4121_v53, %v4121_v53  ;;  %v3698_v53 = vld [vmem:[%s4815_s1 + $0x18] sm:$0xff]  }
  0xdd   : > { %v443_v5 = vpop.f32.mrf.mxu0  ;;  %v496_v6 = vpop.f32.mrf.mxu1 }
  0xde   : > { %v444_v10 = vadd.f32 %v443_v5, %v334_v63  ;;  %v497_v11 = vadd.f32 %v496_v6, %v334_v63  ;;  %v4130_v18 = vpack.c.bf16 %v442_v2, %v438_v12  ;;  %v4132_v19 = vpack.c.bf16 %v495_v4, %v491_v13 }
  0xdf   : > { %v447_v14 = vpop.f32.mrf.mxu0  ;;  %v500_v15 = vpop.f32.mrf.mxu1 }
  0xe0   : > { %v4126_v16 = vpack.c.bf16 %v444_v10, %v440_v7  ;;  %v4128_v17 = vpack.c.bf16 %v497_v11, %v493_v8  ;;  %v448_v33 = vadd.f32 %v447_v14, %v339_v9  ;;  %v501_v34 = vadd.f32 %v500_v15, %v339_v9 }
  0xe1   : > { %v449_v20 = vpop.f32.mrf.mxu0  ;;  %v502_v21 = vpop.f32.mrf.mxu1 }
  0xe2   : > { %805 = vmatprep.mubr.bf16.mxu0 %v4126_v16  ;;  %854 = vmatprep.mubr.bf16.mxu1 %v4128_v17  ;;  %v450_v25 = vadd.f32 %v449_v20, %v339_v9  ;;  %v503_v29 = vadd.f32 %v502_v21, %v339_v9  ;;  %v950_v9 = vrot.slane %v936_v62, %v4116_v52  ;;  %v3915_v52 = vmov 1   ;;  %v3746_v62 = vld [vmem:[%s4817_s3 + $0x180] ss:$12 sps:$4 sm:$0xff]  }
  0xe3   : > { %v451_v22 = vpop.f32.mrf.mxu0  ;;  %v504_v23 = vpop.f32.mrf.mxu1  ;;  %806 = vmatmul.mubr.bf16.vlgmr.msra.gmra.mxu0 %v4130_v18  ;;  %855 = vmatmul.mubr.bf16.vlgmr.msra.gmra.mxu1 %v4132_v19 }
  0xe4   : > { %3268 = vmatpush1.msk.msra.mxu1 %vm960_vm1, %v943_v54  ;;  %v452_v26 = vadd.f32 %v451_v22, %v344_v24  ;;  %v505_v30 = vadd.f32 %v504_v23, %v344_v24  ;;  %v952_v13 = vcombine.high %v950_v9, %v950_v9  ;;  %3544 = vset.pattern.permute.xlu0 %v3915_v52 }
  0xe5   : > { %v453_v27 = vpop.f32.mrf.mxu0  ;;  %v506_v28 = vpop.f32.mrf.mxu1  ;;  %3545 = vset.pattern.permute.xlu1 %v3915_v52  ;;  %1226 = vperm.xlu0 %3544, %v3987_v1   ;;  %v3767_v52 = vld [vmem:[%s4817_s3 + $0x120] ss:$12 sps:$4 sm:$0xff]  }
  0xe6   : > { %v454_v31 = vadd.f32 %v453_v27, %v344_v24  ;;  %v507_v32 = vadd.f32 %v506_v28, %v344_v24  ;;  %v4139_v37 = vpack.c.bf16 %v452_v26, %v448_v33  ;;  %v4141_v38 = vpack.c.bf16 %v505_v30, %v501_v34  ;;  %1230 = vperm.xlu1 %3545, %v3998_v3   ;;  %v3704_v33 = vld [vmem:[%s4817_s3 + $0x228] ss:$12 sps:$4 sm:$0xff]  }
  0xe7   : > { %v3709_v34 = vld [vmem:[%s4817_s3 + $0x94] ss:$12 sps:$4 sm:$0xff]  }
  0xe8   : > { %v514_v35 = vpack.c.bf16 %v454_v31, %v450_v25  ;;  %v516_v36 = vpack.c.bf16 %v507_v32, %v503_v29  ;;  %v3703_v31 = vld [vmem:[%s4817_s3 + $0xac] ss:$12 sps:$4 sm:$0xff]  }
  0xe9   : > { %v3706_v32 = vld [vmem:[%s4817_s3 + $0x22c] ss:$12 sps:$4 sm:$0xff]  }
  0xea   : > { %813 = vmatprep.mubr.bf16.mxu0 %v514_v35  ;;  %862 = vmatprep.mubr.bf16.mxu1 %v516_v36 }
  0xeb   : > { %1143 = vmatprep.subr.bf16.mxu1 %v514_v35  ;;  %814 = vmatmul.mubr.bf16.gmra.mxu0 %v4139_v37  ;;  %v3710_v35 = vld [vmem:[%s4817_s3 + $0x210] ss:$12 sps:$4 sm:$0xff]  }
  0xec   : > { %863 = vmatmul.mubr.bf16.gmra.mxu1 %v4141_v38  ;;  %3515 = vmatprep.mubr.msk.bf16.mxu0 %vm3914_vm2, %v3913_v39 }
  0xed   : > { %1033 = vmatprep.mubr.f32.mxu1 %v3913_v39 }
 0x1a3   : > { %v3433_v40 = vpop.f32.mrf.mxu0  ;;  %v3461_v41 = vpop.f32.mrf.mxu1 }
 0x1a5   : > { %v3434_v42 = vpop.f32.mrf.mxu0  ;;  %v3462_v43 = vpop.f32.mrf.mxu1 }
 0x1a6   : > { %v3435_v5 = vadd.f32 %v3434_v42, %v3433_v40  ;;  %v3463_v6 = vadd.f32 %v3462_v43, %v3461_v41  ;;  %v3721_v40 = vld [vmem:[%s4817_s3 + $0x64] ss:$12 sps:$4 sm:$0xff]   ;;  %v3719_v42 = vld [vmem:[%s4817_s3 + $0x60] ss:$12 sps:$4 sm:$0xff]  }
 0x1a7   : > { %v3436_v44 = vpop.f32.mrf.mxu0  ;;  %v3464_v45 = vpop.f32.mrf.mxu1  ;;  %v3724_v41 = vld [vmem:[%s4817_s3 + $0x1e4] ss:$12 sps:$4 sm:$0xff]   ;;  %v3722_v43 = vld [vmem:[%s4817_s3 + $0x1e0] ss:$12 sps:$4 sm:$0xff]  }
 0x1a8   : > { %v857_v12 = vadd.f32 %v3463_v6, %v3435_v5  ;;  %v3752_v5 = vld [vmem:[%s4817_s3 + $0x2e8] ss:$12 sps:$4 sm:$0xff]  }
 0x1a9   : > { %v3437_v46 = vpop.f32.mrf.mxu0  ;;  %v3465_v47 = vpop.f32.mrf.mxu1  ;;  %v3757_v6 = vld [vmem:[%s4817_s3 + $0x154] ss:$12 sps:$4 sm:$0xff]  }
 0x1aa   : > { %v3438_v63 = vadd.f32 %v3437_v46, %v3436_v44  ;;  %v3466_v2 = vadd.f32 %v3465_v47, %v3464_v45  ;;  %v3727_v44 = vld [vmem:[%s4817_s3 + $0x4c] ss:$12 sps:$4 sm:$0xff]   ;;  %v3725_v46 = vld [vmem:[%s4817_s3 + $0x48] ss:$12 sps:$4 sm:$0xff]  }
 0x1ab   : > { %v3439_v48 = vpop.f32.mrf.mxu0  ;;  %v3730_v45 = vld [vmem:[%s4817_s3 + $0x1cc] ss:$12 sps:$4 sm:$0xff]   ;;  %v3728_v47 = vld [vmem:[%s4817_s3 + $0x1c8] ss:$12 sps:$4 sm:$0xff]  }
 0x1ac   : > { %v3467_v50 = vpop.f32.mrf.mxu1  ;;  %v860_v10 = vadd.f32 %v3466_v2, %v3438_v63  ;;  %v3751_v63 = vld [vmem:[%s4817_s3 + $0x16c] ss:$12 sps:$4 sm:$0xff]  }
 0x1ad   : > { %v3440_v51 = vpop.f32.mrf.mxu0  ;;  %v3754_v2 = vld [vmem:[%s4817_s3 + $0x2ec] ss:$12 sps:$4 sm:$0xff]  }
 0x1ae   : > { %v3468_v54 = vpop.f32.mrf.mxu1  ;;  %v3441_v57 = vadd.f32 %v3440_v51, %v3439_v48  ;;  %v871_v14 = vpack.c.bf16 %v860_v10, %v857_v12  ;;  %v3731_v48 = vld [vmem:[%s4817_s3 + $0x30] ss:$12 sps:$4 sm:$0xff]   ;;  %v3761_v12 = vld [vmem:[%s4817_s3 + $0x138] ss:$12 sps:$4 sm:$0xff]  }
 0x1af   : > { %v3442_v55 = vpop.f32.mrf.mxu0  ;;  %v3469_v58 = vadd.f32 %v3468_v54, %v3467_v50  ;;  %v3733_v50 = vld [vmem:[%s4817_s3 + $0x34] ss:$12 sps:$4 sm:$0xff]   ;;  %v3734_v51 = vld [vmem:[%s4817_s3 + $0x1b0] ss:$12 sps:$4 sm:$0xff]  }
 0x1b0   : > { %v3470_v56 = vpop.f32.mrf.mxu1  ;;  %v3736_v54 = vld [vmem:[%s4817_s3 + $0x1b4] ss:$12 sps:$4 sm:$0xff]   ;;  %v3763_v10 = vld [vmem:[%s4817_s3 + $0x13c] ss:$12 sps:$4 sm:$0xff]  }
 0x1b1   : > { %v3443_v59 = vpop.f32.mrf.mxu0  ;;  %v865_v7 = vadd.f32 %v3469_v58, %v3441_v57  ;;  %v3740_v57 = vld [vmem:[%s4817_s3 + $0x198] ss:$12 sps:$4 sm:$0xff]   ;;  %v3742_v58 = vld [vmem:[%s4817_s3 + $0x19c] ss:$12 sps:$4 sm:$0xff]  }
 0x1b2   : > { %v3444_v60 = vadd.f32 %v3443_v59, %v3442_v55  ;;  %v3471_v61 = vpop.f32.mrf.mxu1  ;;  %v3737_v55 = vld [vmem:[%s4817_s3 + $0x18] ss:$12 sps:$4 sm:$0xff]  }
 0x1b3   : > { %v3472_v4 = vadd.f32 %v3471_v61, %v3470_v56  ;;  %v3739_v56 = vld [vmem:[%s4817_s3 + $0x1c] ss:$12 sps:$4 sm:$0xff]   ;;  %v3745_v59 = vld [vmem:[%s4817_s3 + $0x4] ss:$12 sps:$4 sm:$0xff]   ;;  %v3743_v61 = vld [vmem:[%s4817_s3] ss:$12 sps:$4 sm:$0xff]  }
 0x1b5   : > { %v868_v8 = vadd.f32 %v3472_v4, %v3444_v60  ;;  %v3748_v60 = vld [vmem:[%s4817_s3 + $0x184] ss:$12 sps:$4 sm:$0xff]   ;;  %v3749_v4 = vld [vmem:[%s4817_s3 + $0x168] ss:$12 sps:$4 sm:$0xff]  }
 0x1b7   : > { %v872_v11 = vpack.c.bf16 %v868_v8, %v865_v7  ;;  %v3760_v7 = vld [vmem:[%s4817_s3 + $0x2d4] ss:$12 sps:$4 sm:$0xff]   ;;  %v3755_v8 = vld [vmem:[%s4817_s3 + $0x150] ss:$12 sps:$4 sm:$0xff]  }
 0x1b9   : > { %3512 = vmatpush3.bf16.msra.mxu0 %v872_v11  ;;  %v3766_v11 = vld [vmem:[%s4817_s3 + $0x2bc] ss:$12 sps:$4 sm:$0xff]  }
 0x1ba   : > { %3513 = vmatprep.subr.bf16.mxu0 %v3913_v39 }
 0x1bd   : > { %3514 = vmatpush3.bf16.msra.mxu0 %v871_v14  ;;  %v3769_v14 = vld [vmem:[%s4817_s3 + $0x124] ss:$12 sps:$4 sm:$0xff]  }
 0x1be   : > { %3271 = vmatprep.subr.msk.mxu0 %vm960_vm1, %v952_v13  ;;  %v3764_v13 = vld [vmem:[%s4817_s3 + $0x2b8] ss:$12 sps:$4 sm:$0xff]  }
 0x1c0   : > { %3516 = vmatmul.mubr.msk.bf16.vlgmr.msra.gmra.mxu0 %vm396_vm0, %v3698_v53  ;;  %v3772_v53 = vld [vmem:[%s4817_s3 + $0x2a4] ss:$12 sps:$4 sm:$0xff]  }
 0x1c1   : > { %3272 = vmatpush1.msk.msra.mxu0 %vm960_vm1, %v950_v9  ;;  %1110 = vmatprep.mubr.f32.mxu0 %v3913_v39  ;;  %v3758_v9 = vld [vmem:[%s4817_s3 + $0x2d0] ss:$12 sps:$4 sm:$0xff]  }
 0x1c2   : > { %1186 = vmatprep.subr.bf16.mxu0 %v516_v36  ;;  %v3715_v36 = vld [vmem:[%s4817_s3 + $0x7c] ss:$12 sps:$4 sm:$0xff]  }
 0x280   : > { %v915_v15 = vpop.f32.mrf.mxu0 }
 0x281   : > { %v922_v20 = vsub.f32 0.0, %v915_v15  ;;  %v3770_v15 = vld [vmem:[%s4817_s3 + $0x2a0] ss:$12 sps:$4 sm:$0xff]  }
 0x282   : > { %v3517_v21 = vpop.f32.mrf.mxu0 }
 0x283   : > { %v924_v22 = vmul.f32 1.442695, %v922_v20  ;;  %v3775_v20 = vld [vmem:[%s4817_s3 + $0x10c] ss:$12 sps:$4 sm:$0xff]   ;;  %v3773_v21 = vld [vmem:[%s4817_s3 + $0x108] ss:$12 sps:$4 sm:$0xff]  }
 0x284   : > { %v918_v23 = vpop.f32.mrf.mxu0 }
 0x285   : > { %3857 = vpow2.f32 %v924_v22  ;;  %v923_v24 = vsub.f32 0.0, %v918_v23  ;;  %v3776_v22 = vld [vmem:[%s4817_s3 + $0x288] ss:$12 sps:$4 sm:$0xff]   ;;  %v3778_v23 = vld [vmem:[%s4817_s3 + $0x28c] ss:$12 sps:$4 sm:$0xff]  }
 0x286   : > { %v3518_v25 = vpop.f32.mrf.mxu0 }
 0x287   : > { %v926_v26 = vmul.f32 1.442695, %v923_v24  ;;  %v3781_v24 = vld [vmem:[%s4817_s3 + $0xf4] ss:$12 sps:$4 sm:$0xff]  }
 0x288   : > { %v3784_v25 = vld [vmem:[%s4817_s3 + $0x274] ss:$12 sps:$4 sm:$0xff]  }
 0x289   : > { %3859 = vpow2.f32 %v926_v26  ;;  %v3779_v26 = vld [vmem:[%s4817_s3 + $0xf0] ss:$12 sps:$4 sm:$0xff]  }
 0x292   : > { %v3858_v27 = vpop.eup %3857 }
 0x293   : > { %v928_v28 = vadd.f32 1.0, %v3858_v27  ;;  %v3782_v27 = vld [vmem:[%s4817_s3 + $0x270] ss:$12 sps:$4 sm:$0xff]  }
 0x295   : > { %3861 = vrcp.f32 %v928_v28  ;;  %v3787_v28 = vld [vmem:[%s4817_s3 + $0xdc] ss:$12 sps:$4 sm:$0xff]  }
 0x296   : > { %v3860_v29 = vpop.eup %3859 }
 0x297   : > { %v929_v30 = vadd.f32 1.0, %v3860_v29  ;;  %v3790_v29 = vld [vmem:[%s4817_s3 + $0x25c] ss:$12 sps:$4 sm:$0xff]  }
 0x299   : > { %3863 = vrcp.f32 %v929_v30  ;;  %v3785_v30 = vld [vmem:[%s4817_s3 + $0xd8] ss:$12 sps:$4 sm:$0xff]  }
 0x2a2   : > { %v3862_v1 = vpop.eup %3861 }
 0x2a3   : > { %3269 = vmatmul.mubr.msk.f32.vlgmr.msra.gmra.mxu1 %vm953_vm3, %v3862_v1  ;;  %3273 = vmatmul.mubr.msk.f32.vlgmr.msra.gmra.mxu0 %vm953_vm3, %v3862_v1  ;;  %v3788_v1 = vld [vmem:[%s4817_s3 + $0x258] ss:$12 sps:$4 sm:$0xff]  }
 0x2a4   : > { %1144 = vmatpush1.bf16.msra.mxu1 %v4139_v37  ;;  %1187 = vmatpush1.bf16.msra.mxu0 %v4141_v38  ;;  %v3718_v37 = vld [vmem:[%s4817_s3 + $0x1fc] ss:$12 sps:$4 sm:$0xff]   ;;  %v3713_v38 = vld [vmem:[%s4817_s3 + $0x78] ss:$12 sps:$4 sm:$0xff]  }
 0x2a5   : > { %1145 = vmatprep.subr.bf16.mxu1 %v4126_v16  ;;  %1188 = vmatprep.subr.bf16.mxu0 %v4128_v17  ;;  %v3700_v16 = vld [vmem:[%s4815_s1 + $0x10] sm:$0xff]  }
 0x2a6   : > { %v3864_v3 = vpop.eup %3863  ;;  %1039 = vmatprep.mubr.f32.mxu1 %v3913_v39  ;;  %1116 = vmatprep.mubr.f32.mxu0 %v3913_v39  ;;  %v3701_v17 = vld [vmem:[%s4817_s3 + $0xa8] ss:$12 sps:$4 sm:$0xff]   ;;  %v3716_v39 = vld [vmem:[%s4817_s3 + $0x1f8] ss:$12 sps:$4 sm:$0xff]  }
 0x2a7   : > { %3270 = vmatmul.mubr.msk.f32.gmra.mxu1 %vm953_vm3, %v3864_v3  ;;  %3274 = vmatmul.mubr.msk.f32.gmra.mxu0 %vm953_vm3, %v3864_v3  ;;  %v3793_v3 = vld [vmem:[%s4817_s3 + $0xc4] ss:$12 sps:$4 sm:$0xff]  }
 0x2a8   : > { %1146 = vmatpush1.bf16.msra.mxu1 %v4130_v18  ;;  %1189 = vmatpush1.bf16.msra.mxu0 %v4132_v19  ;;  %v3712_v18 = vld [vmem:[%s4817_s3 + $0x214] ss:$12 sps:$4 sm:$0xff]   ;;  %v3707_v19 = vld [vmem:[%s4817_s3 + $0x90] ss:$12 sps:$4 sm:$0xff]  }
 0x2a9   : > { %1163 = vmatprep.mubr.bf16.mxu1 %v3911_v0  ;;  %1206 = vmatprep.mubr.bf16.mxu0 %v3911_v0 }
 0x2aa   : > { %1693 = vmatprep.subr.bf16.mxu1 %v3703_v31  ;;  %1736 = vmatprep.subr.bf16.mxu0 %v3706_v32  ;;  %v3796_v31 = vld [vmem:[%s4817_s3 + $0x244] ss:$12 sps:$4 sm:$0xff]   ;;  %v3791_v32 = vld [vmem:[%s4817_s3 + $0xc0] ss:$12 sps:$4 sm:$0xff]  }
 0x2ab   : > { %3276 = vmatmul.mubr.msk.bf16.vlgmr.msra.gmra.mxu1 %vm396_vm0, %v3700_v16  ;;  %3277 = vmatmul.mubr.msk.bf16.vlgmr.msra.gmra.mxu0 %vm396_vm0, %v3700_v16  ;;  %v3794_v16 = vld [vmem:[%s4817_s3 + $0x240] ss:$12 sps:$4 sm:$0xff]  }
 0x2ac   : > { %1694 = vmatpush1.bf16.msra.mxu1 %v3701_v17  ;;  %1737 = vmatpush1.bf16.msra.mxu0 %v3704_v33 }
 0x2ad   : > { %1695 = vmatprep.subr.bf16.mxu1 %v3709_v34  ;;  %1738 = vmatprep.subr.bf16.mxu0 %v3712_v18 }
 0x2b0   : > { %1696 = vmatpush1.bf16.msra.mxu1 %v3707_v19  ;;  %1739 = vmatpush1.bf16.msra.mxu0 %v3710_v35 }
 0x2b1   : > { %1697 = vmatprep.subr.bf16.mxu1 %v3715_v36  ;;  %1740 = vmatprep.subr.bf16.mxu0 %v3718_v37 }
 0x2b4   : > { %1698 = vmatpush1.bf16.msra.mxu1 %v3713_v38  ;;  %1741 = vmatpush1.bf16.msra.mxu0 %v3716_v39  ;;  %v1227_v38 = vpop.permute.xlu0 %1226 }
 0x2b5   : > { %1699 = vmatprep.subr.bf16.mxu1 %v3721_v40  ;;  %1742 = vmatprep.subr.bf16.mxu0 %v3724_v41 }
 0x2b8   : > { %1700 = vmatpush1.bf16.msra.mxu1 %v3719_v42  ;;  %1743 = vmatpush1.bf16.msra.mxu0 %v3722_v43 }
 0x2b9   : > { %1701 = vmatprep.subr.bf16.mxu1 %v3727_v44  ;;  %1744 = vmatprep.subr.bf16.mxu0 %v3730_v45 }
 0x2bc   : > { %1702 = vmatpush1.bf16.msra.mxu1 %v3725_v46  ;;  %1745 = vmatpush1.bf16.msra.mxu0 %v3728_v47 }
 0x2bd   : > { %1703 = vmatprep.subr.bf16.mxu1 %v3733_v50  ;;  %1746 = vmatprep.subr.bf16.mxu0 %v3736_v54 }
 0x2c0   : > { %1704 = vmatpush1.bf16.msra.mxu1 %v3731_v48  ;;  %1747 = vmatpush1.bf16.msra.mxu0 %v3734_v51 }
 0x2c1   : > { %1705 = vmatprep.subr.bf16.mxu1 %v3739_v56  ;;  %1748 = vmatprep.subr.bf16.mxu0 %v3742_v58  ;;  %v1231_v56 = vpop.permute.xlu1 %1230 }
 0x2c4   : > { %1706 = vmatpush1.bf16.msra.mxu1 %v3737_v55  ;;  %1749 = vmatpush1.bf16.msra.mxu0 %v3740_v57 }
 0x2c5   : > { %1707 = vmatprep.subr.bf16.mxu1 %v3745_v59  ;;  %1750 = vmatprep.subr.bf16.mxu0 %v3748_v60 }
 0x2c8   : > { %1708 = vmatpush1.bf16.msra.mxu1 %v3743_v61  ;;  %1751 = vmatpush1.bf16.msra.mxu0 %v3746_v62 }
 0x2c9   : > { %1709 = vmatprep.subr.bf16.mxu1 %v3751_v63  ;;  %1752 = vmatprep.subr.bf16.mxu0 %v3754_v2 }
 0x2cc   : > { %1710 = vmatpush2.bf16.msra.mxu1 %v3749_v4  ;;  %1753 = vmatpush2.bf16.msra.mxu0 %v3752_v5 }
 0x2cd   : > { %1711 = vmatprep.subr.bf16.mxu1 %v3757_v6  ;;  %1754 = vmatprep.subr.bf16.mxu0 %v3760_v7 }
 0x2d0   : > { %1712 = vmatpush2.bf16.msra.mxu1 %v3755_v8  ;;  %1755 = vmatpush2.bf16.msra.mxu0 %v3758_v9 }
 0x2d1   : > { %1713 = vmatprep.subr.bf16.mxu1 %v3763_v10  ;;  %1756 = vmatprep.subr.bf16.mxu0 %v3766_v11 }
 0x2d4   : > { %1714 = vmatpush2.bf16.msra.mxu1 %v3761_v12  ;;  %1757 = vmatpush2.bf16.msra.mxu0 %v3764_v13 }
 0x2d5   : > { %1715 = vmatprep.subr.bf16.mxu1 %v3769_v14  ;;  %1758 = vmatprep.subr.bf16.mxu0 %v3772_v53 }
 0x2d8   : > { %1716 = vmatpush2.bf16.msra.mxu1 %v3767_v52  ;;  %1759 = vmatpush2.bf16.msra.mxu0 %v3770_v15 }
 0x2d9   : > { %1717 = vmatprep.subr.bf16.mxu1 %v3775_v20  ;;  %1760 = vmatprep.subr.bf16.mxu0 %v3778_v23 }
 0x2dc   : > { %1718 = vmatpush2.bf16.msra.mxu1 %v3773_v21  ;;  %1761 = vmatpush2.bf16.msra.mxu0 %v3776_v22 }
 0x2dd   : > { %1719 = vmatprep.subr.bf16.mxu1 %v3781_v24  ;;  %1762 = vmatprep.subr.bf16.mxu0 %v3784_v25 }
 0x2e0   : > { %1720 = vmatpush2.bf16.msra.mxu1 %v3779_v26  ;;  %1763 = vmatpush2.bf16.msra.mxu0 %v3782_v27 }
 0x2e1   : > { %1721 = vmatprep.subr.bf16.mxu1 %v3787_v28  ;;  %1764 = vmatprep.subr.bf16.mxu0 %v3790_v29 }
 0x2e4   : > { %1722 = vmatpush2.bf16.msra.mxu1 %v3785_v30  ;;  %1765 = vmatpush2.bf16.msra.mxu0 %v3788_v1 }
 0x2e5   : > { %1723 = vmatprep.subr.bf16.mxu1 %v3793_v3  ;;  %1766 = vmatprep.subr.bf16.mxu0 %v3796_v31 }
 0x2e8   : > { %1724 = vmatpush2.bf16.msra.mxu1 %v3791_v32  ;;  %1767 = vmatpush2.bf16.msra.mxu0 %v3794_v16 }
 0x363   : > { %v1035_v17 = vpop.f32.mrf.mxu1  ;;  %v1112_v33 = vpop.f32.mrf.mxu0 }
 0x365   : > { %v1037_v34 = vpop.f32.mrf.mxu1  ;;  %v1114_v18 = vpop.f32.mrf.mxu0 }
 0x367   : > { %v1041_v19 = vpop.f32.mrf.mxu1  ;;  %v1118_v35 = vpop.f32.mrf.mxu0 }
 0x369   : > { %v1043_v36 = vpop.f32.mrf.mxu1  ;;  %v1120_v37 = vpop.f32.mrf.mxu0 }
 0x36b   : > { %v1165_v39 = vpop.f32.mrf.mxu1  ;;  %v1208_v40 = vpop.f32.mrf.mxu0 }
 0x36c   : > { %v1217_v41 = vmul.f32 %v1165_v39, %v1035_v17  ;;  %v1219_v42 = vmul.f32 %v1208_v40, %v1112_v33 }
 0x36d   : > { %v1167_v43 = vpop.f32.mrf.mxu1  ;;  %v1210_v44 = vpop.f32.mrf.mxu0 }
 0x36e   : > { %v4368_v45 = vadd.f32 %v1227_v38, %v1217_v41  ;;  %v4370_v46 = vadd.f32 %v1227_v38, %v1219_v42  ;;  %v1218_v47 = vmul.f32 %v1167_v43, %v1037_v34  ;;  %v1220_v48 = vmul.f32 %v1210_v44, %v1114_v18 }
 0x36f   : > { %v1169_v50 = vpop.f32.mrf.mxu1  ;;  %v1212_v51 = vpop.f32.mrf.mxu0 }
 0x370   : > { %v1241_v54 = vand.u32 2147483647, %v4368_v45  ;;  %v1243_v55 = vand.u32 2147483647, %v4370_v46  ;;  %v4374_v57 = vadd.f32 %v1227_v38, %v1218_v47  ;;  %v4376_v58 = vadd.f32 %v1227_v38, %v1220_v48 }
 0x371   : > { %v1221_v59 = vmul.f32 %v1169_v50, %v1041_v19  ;;  %v1223_v60 = vmul.f32 %v1212_v51, %v1118_v35  ;;  %v1171_v61 = vpop.f32.mrf.mxu1  ;;  %v1214_v62 = vpop.f32.mrf.mxu0  ;;  %vm1273_vm4 = vcmp.ge.f32.partialorder %v4368_v45, 0.0  ;;  %vm1275_vm5 = vcmp.ge.f32.partialorder %v4370_v46, 0.0 }
 0x372   : > { %v1249_v63 = vsub.f32 0.0, %v1241_v54  ;;  %v1251_v2 = vsub.f32 0.0, %v1243_v55  ;;  %v1222_v4 = vmul.f32 %v1171_v61, %v1043_v36  ;;  %v1224_v5 = vmul.f32 %v1214_v62, %v1120_v37 }
 0x373   : > { %v1242_v6 = vand.u32 2147483647, %v4374_v57  ;;  %v1244_v7 = vand.u32 2147483647, %v4376_v58  ;;  %v1237_v10 = vadd.f32 %v1231_v56, %v1221_v59  ;;  %v4380_v11 = vadd.f32 %v1231_v56, %v1223_v60 }
 0x374   : > { %v1257_v8 = vmul.f32 1.442695, %v1249_v63  ;;  %v1261_v9 = vmul.f32 1.442695, %v1251_v2  ;;  %v1238_v14 = vadd.f32 %v1231_v56, %v1222_v4  ;;  %v4382_v53 = vadd.f32 %v1231_v56, %v1224_v5 }
 0x375   : > { %v1250_v12 = vsub.f32 0.0, %v1242_v6  ;;  %v1252_v13 = vsub.f32 0.0, %v1244_v7  ;;  %v1245_v52 = vand.u32 2147483647, %v1237_v10  ;;  %v1247_v15 = vand.u32 2147483647, %v4380_v11 }
 0x376   : > { %3865 = vpow2.f32 %v1257_v8  ;;  %v1246_v24 = vand.u32 2147483647, %v1238_v14  ;;  %v1248_v25 = vand.u32 2147483647, %v4382_v53  ;;  %vm1274_vm6 = vcmp.ge.f32.partialorder %v4374_v57, 0.0 }
 0x377   : > { %v1259_v20 = vmul.f32 1.442695, %v1250_v12  ;;  %v1263_v21 = vmul.f32 1.442695, %v1252_v13  ;;  %v1253_v22 = vsub.f32 0.0, %v1245_v52  ;;  %v1255_v23 = vsub.f32 0.0, %v1247_v15 }
 0x378   : > { %3867 = vpow2.f32 %v1261_v9  ;;  %v1254_v28 = vsub.f32 0.0, %v1246_v24  ;;  %v1256_v29 = vsub.f32 0.0, %v1248_v25  ;;  %vm1276_vm7 = vcmp.ge.f32.partialorder %v4376_v58, 0.0  ;;  %v4419_v24 = vld [vmem:[%s4820_s6] sm:$0xff]  ;;  %v4425_v25 = vld [vmem:[%s4820_s6 + $0x8] sm:$0xff] }
 0x379   : > { %3869 = vpow2.f32 %v1259_v20  ;;  %v1265_v26 = vmul.f32 1.442695, %v1253_v22  ;;  %v1269_v27 = vmul.f32 1.442695, %v1255_v23  ;;  %vm1277_vm8 = vcmp.ge.f32.partialorder %v1237_v10, 0.0  ;;  %v3798_v22 = vld [vmem:[%s4816_s2] sm:$0xff]  }
 0x37a   : > { %3871 = vpow2.f32 %v1263_v21  ;;  %v1267_v30 = vmul.f32 1.442695, %v1254_v28  ;;  %v1271_v1 = vmul.f32 1.442695, %v1256_v29  ;;  %vm1279_vm9 = vcmp.ge.f32.partialorder %v4380_v11, 0.0 }
 0x37b   : > { %3873 = vpow2.f32 %v1265_v26  ;;  %vm1278_vm10 = vcmp.ge.f32.partialorder %v1238_v14, 0.0  ;;  %vm1280_vm11 = vcmp.ge.f32.partialorder %v4382_v53, 0.0  ;;  %v3923_v23 = vmov 2  }
 0x37c   : > { %3875 = vpow2.f32 %v1269_v27  ;;  %3617 = vset.pattern.permute.xlu0 %v3923_v23  ;;  %3616 = vset.pattern.permute.xlu1 %v3923_v23  ;;  %v4429_v26 = vand.u32 127, %v940_v49 }
 0x37d   : > { %3877 = vpow2.f32 %v1267_v30 }
 0x37e   : > { %3879 = vpow2.f32 %v1271_v1  ;;  %vm1793_vm13 = vcmp.lt.s32.totalorder %v4429_v26, 127  ;;  %vm1913_vm14 = vcmp.lt.s32.totalorder %v4429_v26, 126  ;;  %vm1985_vm15 = vcmp.lt.s32.totalorder %v4429_v26, 125 }
 0x37f   : > { %vm2057_vm0 = vcmp.lt.s32.totalorder %v4429_v26, 124  ;;  %vm2129_vm2 = vcmp.lt.s32.totalorder %v4429_v26, 123  ;;  %vm2201_vm3 = vcmp.lt.s32.totalorder %v4429_v26, 122 }
 0x383   : > { %v3866_v3 = vpop.eup %3865 }
 0x384   : > { %v1281_v33 = vsub.f32 1.0, %v3866_v3  ;;  %v3278_v34 = vadd.f32 -1.0, %v3866_v3 }
 0x385   : > { %v3868_v31 = vpop.eup %3867 }
 0x386   : > { %v3870_v32 = vpop.eup %3869  ;;  %v1283_v48 = vsub.f32 1.0, %v3868_v31  ;;  %v3280_v50 = vadd.f32 -1.0, %v3868_v31  ;;  %v1297_v2 = vsel %vm1273_vm4, %v1281_v33, %v3278_v34  ;;  %vm2273_vm4 = vcmp.lt.s32.totalorder %v4429_v26, 121  ;;  %v3061_v26 = vld [vmem:[%s4821_s7 + $0xf8] sm:$0xff] }
 0x387   : > { %v3872_v16 = vpop.eup %3871  ;;  %v1282_v19 = vsub.f32 1.0, %v3870_v32  ;;  %v3279_v35 = vadd.f32 -1.0, %v3870_v32 }
 0x388   : > { %v3874_v17 = vpop.eup %3873  ;;  %v1284_v39 = vsub.f32 1.0, %v3872_v16  ;;  %v3281_v40 = vadd.f32 -1.0, %v3872_v16  ;;  %v1299_v6 = vsel %vm1275_vm5, %v1283_v48, %v3280_v50 }
 0x389   : > { %v3876_v18 = vpop.eup %3875  ;;  %v1285_v36 = vsub.f32 1.0, %v3874_v17  ;;  %v3282_v37 = vadd.f32 -1.0, %v3874_v17  ;;  %v1298_v56 = vsel %vm1274_vm6, %v1282_v19, %v3279_v35 }
 0x38a   : > { %v3878_v38 = vpop.eup %3877  ;;  %v1287_v41 = vsub.f32 1.0, %v3876_v18  ;;  %v3284_v42 = vadd.f32 -1.0, %v3876_v18  ;;  %v1300_v62 = vsel %vm1276_vm7, %v1284_v39, %v3281_v40 }
 0x38b   : > { %v3880_v43 = vpop.eup %3879  ;;  %v1286_v44 = vsub.f32 1.0, %v3878_v38  ;;  %v3283_v47 = vadd.f32 -1.0, %v3878_v38  ;;  %v1301_v55 = vsel %vm1277_vm8, %v1285_v36, %v3282_v37 }
 0x38c   : > { %v1288_v51 = vsub.f32 1.0, %v3880_v43  ;;  %v3285_v54 = vadd.f32 -1.0, %v3880_v43  ;;  %v1303_v60 = vsel %vm1279_vm9, %v1287_v41, %v3284_v42  ;;  %v1305_v5 = vpack.c.bf16 %v1301_v55, %v1297_v2  ;;  %v3797_v41 = vld [vmem:[%s4816_s2 + $0x8] sm:$0xff]  }
 0x38d   : > { %v1302_v59 = vsel %vm1278_vm10, %v1286_v44, %v3283_v47  ;;  %v1307_v57 = vpack.c.bf16 %v1303_v60, %v1299_v6 }
 0x38e   : > { %v1306_v61 = vpack.c.bf16 %v1302_v59, %v1298_v56  ;;  %v1304_v63 = vsel %vm1280_vm11, %v1288_v51, %v3285_v54 }
 0x38f   : > { %v1308_v4 = vpack.c.bf16 %v1304_v63, %v1300_v62 }
 0x390   : > { %1725 = vmatprep.mubr.bf16.mxu1 %v1306_v61 }
 0x391   : > { %1768 = vmatprep.mubr.bf16.mxu0 %v1308_v4  ;;  %1726 = vmatmul.mubr.bf16.vlgmr.msra.gmra.mxu1 %v1305_v5 }
 0x392   : > { %1769 = vmatmul.mubr.bf16.vlgmr.msra.gmra.mxu0 %v1307_v57  ;;  %1843 = vmatprep.mubr.bf16.mxu1 %v3911_v0 }
 0x393   : > { %1894 = vmatprep.mubr.bf16.mxu0 %v3911_v0 }
 0x451   : > { %v1727_v58 = vpop.f32.mrf.mxu1 }
 0x452   : > { %v1770_v7 = vpop.f32.mrf.mxu0 }
 0x453   : > { %v1729_v8 = vpop.f32.mrf.mxu1  ;;  %v1771_v11 = vadd.f32 %v1770_v7, %v1727_v58 }
 0x454   : > { %v1772_v9 = vpop.f32.mrf.mxu0 }
 0x455   : > { %v1731_v45 = vpop.f32.mrf.mxu1  ;;  %v1773_v14 = vadd.f32 %v1772_v9, %v1729_v8 }
 0x456   : > { %v1774_v10 = vpop.f32.mrf.mxu0 }
 0x457   : > { %v1775_v12 = vadd.f32 %v1774_v10, %v1731_v45  ;;  %v1733_v13 = vpop.f32.mrf.mxu1  ;;  %v3799_v45 = vld [vmem:[%s4816_s2 + $0x10] sm:$0xff]   ;;  %v3800_v10 = vld [vmem:[%s4816_s2 + $0x18] sm:$0xff]  }
 0x458   : > { %v1776_v46 = vpop.f32.mrf.mxu0 }
 0x459   : > { %v1777_v53 = vadd.f32 %v1776_v46, %v1733_v13  ;;  %v3546_v52 = vpack.i.bf16 %v1775_v12, %v1771_v11  ;;  %v1781_v21 = vpack.c.bf16 %v1775_v12, %v1771_v11 }
 0x45b   : > { %3547 = vrot.lane.b32.xlu1 %v3546_v52, %s3916_s21  ;;  %v3551_v15 = vpack.i.bf16 %v1777_v53, %v1773_v14  ;;  %v1782_v20 = vpack.c.bf16 %v1777_v53, %v1773_v14 }
 0x45d   : > { %3552 = vrot.lane.b32.xlu0 %v3551_v15, %s3916_s21  ;;  %1876 = vmatprep.subr.bf16.mxu0 %v1782_v20 }
 0x45e   : > { %1877 = vmatpush1.bf16.msra.mxu0 %v1781_v21 }
 0x45f   : > { %3557 = vrot.lane.b32.xlu1 %v3546_v52, %s3917_s24 }
 0x461   : > { %3587 = vrot.lane.b32.xlu0 %v3551_v15, %s3917_s24  ;;  %3353 = vmatmul.mubr.msk.bf16.vlgmr.msra.gmra.mxu0 %vm1807_vm12, %v3798_v22 }
 0x462   : > { %2034 = vmatprep.mubr.bf16.mxu0 %v3911_v0 }
 0x463   : > { %3562 = vrot.lane.b32.xlu1 %v3546_v52, %s3918_s25 }
 0x465   : > { %3592 = vrot.lane.b32.xlu0 %v3551_v15, %s3918_s25 }
 0x467   : > { %3567 = vrot.lane.b32.xlu1 %v3546_v52, %s3919_s26 }
 0x469   : > { %3597 = vrot.lane.b32.xlu0 %v3551_v15, %s3919_s26 }
 0x46b   : > { %3572 = vrot.lane.b32.xlu1 %v3546_v52, %s3920_s29 }
 0x46d   : > { %3602 = vrot.lane.b32.xlu0 %v3551_v15, %s3920_s29 }
 0x46f   : > { %3577 = vrot.lane.b32.xlu1 %v3546_v52, %s3921_s30 }
 0x471   : > { %3607 = vrot.lane.b32.xlu0 %v3551_v15, %s3921_s30 }
 0x473   : > { %3582 = vrot.lane.b32.xlu1 %v3546_v52, %s3922_s9 }
 0x475   : > { %3612 = vrot.lane.b32.xlu0 %v3551_v15, %s3922_s9 }
 0x477   : > { %2338 = vperm.xlu1 %3616, %v4419_v24  }
 0x479   : > { %2342 = vperm.xlu0 %3617, %v4425_v25  }
 0x4cd   : > { %v3548_v27 = vpop.permute.xlu1 %3547 }
 0x4ce   : > { %v3550_v29 = vunpack.i.h.bf16 %v3548_v27  ;;  %v3549_v30 = vunpack.i.l.bf16 %v3548_v27 }
 0x4cf   : > { %v3553_v28 = vpop.permute.xlu0 %3552 }
 0x4d0   : > { %v3555_v1 = vunpack.i.h.bf16 %v3553_v28  ;;  %v3554_v3 = vunpack.i.l.bf16 %v3553_v28 }
 0x4d1   : > { %v3558_v31 = vpop.permute.xlu1 %3557 }
 0x4d2   : > { %v1794_v32 = vsel %vm1793_vm13, %v3549_v30, %v3554_v3  ;;  %v1795_v16 = vsel %vm1793_vm13, %v3550_v29, %v3555_v1  ;;  %v3560_v49 = vunpack.i.h.bf16 %v3558_v31  ;;  %v1796_v34 = vsel %vm1793_vm13, %v3554_v3, %v3549_v30 }
 0x4d3   : > { %v1798_v17 = vpack.c.bf16 %v1795_v16, %v1794_v32  ;;  %v3588_v33 = vpop.permute.xlu0 %3587  ;;  %v1797_v18 = vsel %vm1793_vm13, %v3555_v1, %v3550_v29  ;;  %v3559_v19 = vunpack.i.l.bf16 %v3558_v31 }
 0x4d4   : > { %v3590_v35 = vunpack.i.h.bf16 %v3588_v33  ;;  %v3589_v36 = vunpack.i.l.bf16 %v3588_v33  ;;  %v1799_v37 = vpack.c.bf16 %v1797_v18, %v1796_v34  ;;  %v3801_v34 = vld [vmem:[%s4816_s2 + $0x20] sm:$0xff]   ;;  %v3802_v18 = vld [vmem:[%s4816_s2 + $0x28] sm:$0xff]  }
 0x4d5   : > { %v3563_v38 = vpop.permute.xlu1 %3562 }
 0x4d6   : > { %v1914_v39 = vsel %vm1913_vm14, %v3559_v19, %v3589_v36  ;;  %v1915_v40 = vsel %vm1913_vm14, %v3560_v49, %v3590_v35  ;;  %1825 = vmatprep.subr.bf16.mxu1 %v1799_v37  ;;  %v3565_v43 = vunpack.i.h.bf16 %v3563_v38  ;;  %v1916_v47 = vsel %vm1913_vm14, %v3589_v36, %v3559_v19 }
 0x4d7   : > { %v1918_v42 = vpack.c.bf16 %v1915_v40, %v1914_v39  ;;  %1826 = vmatpush1.bf16.msra.mxu1 %v1798_v17  ;;  %v3593_v44 = vpop.permute.xlu0 %3592  ;;  %v1917_v48 = vsel %vm1913_vm14, %v3590_v35, %v3560_v49  ;;  %v3564_v50 = vunpack.i.l.bf16 %v3563_v38 }
 0x4d8   : > { %v3595_v51 = vunpack.i.h.bf16 %v3593_v44  ;;  %v3594_v54 = vunpack.i.l.bf16 %v3593_v44  ;;  %v1919_v55 = vpack.c.bf16 %v1917_v48, %v1916_v47 }
 0x4d9   : > { %v3568_v56 = vpop.permute.xlu1 %3567 }
 0x4da   : > { %v1986_v59 = vsel %vm1985_vm15, %v3564_v50, %v3594_v54  ;;  %v1987_v60 = vsel %vm1985_vm15, %v3565_v43, %v3595_v51  ;;  %3351 = vmatmul.mubr.msk.bf16.vlgmr.msra.gmra.mxu1 %vm1807_vm12, %v3797_v41  ;;  %1944 = vmatprep.subr.bf16.mxu1 %v1919_v55  ;;  %v3570_v62 = vunpack.i.h.bf16 %v3568_v56  ;;  %v1988_v2 = vsel %vm1985_vm15, %v3594_v54, %v3564_v50  ;;  %v3803_v55 = vld [vmem:[%s4816_s2 + $0x30] sm:$0xff]  }
 0x4db   : > { %v1990_v61 = vpack.c.bf16 %v1987_v60, %v1986_v59  ;;  %1945 = vmatpush1.bf16.msra.mxu1 %v1918_v42  ;;  %v3598_v63 = vpop.permute.xlu0 %3597  ;;  %v1989_v4 = vsel %vm1985_vm15, %v3595_v51, %v3565_v43  ;;  %1962 = vmatprep.mubr.bf16.mxu1 %v3911_v0  ;;  %v3569_v5 = vunpack.i.l.bf16 %v3568_v56  ;;  %v3807_v43 = vld [vmem:[%s4818_s4 + $0x74] ss:$8 sps:$4 sm:$0xff]   ;;  %v3805_v59 = vld [vmem:[%s4818_s4 + $0x70] ss:$8 sps:$4 sm:$0xff]   ;;  %v3808_v60 = vld [vmem:[%s4818_s4 + $0x60] ss:$8 sps:$4 sm:$0xff]  }
 0x4dc   : > { %v3600_v6 = vunpack.i.h.bf16 %v3598_v63  ;;  %v3599_v57 = vunpack.i.l.bf16 %v3598_v63  ;;  %v1991_v58 = vpack.c.bf16 %v1989_v4, %v1988_v2  ;;  %v3804_v56 = vld [vmem:[%s4816_s2 + $0x38] sm:$0xff]   ;;  %v3816_v2 = vld [vmem:[%s4818_s4 + $0x44] ss:$8 sps:$4 sm:$0xff]   ;;  %v3814_v4 = vld [vmem:[%s4818_s4 + $0x40] ss:$8 sps:$4 sm:$0xff]  }
 0x4dd   : > { %v3573_v7 = vpop.permute.xlu1 %3572  ;;  %v3813_v63 = vld [vmem:[%s4818_s4 + $0x54] ss:$8 sps:$4 sm:$0xff]  }
 0x4de   : > { %v2058_v8 = vsel %vm2057_vm0, %v3569_v5, %v3599_v57  ;;  %v2059_v9 = vsel %vm2057_vm0, %v3570_v62, %v3600_v6  ;;  %2016 = vmatprep.subr.bf16.mxu0 %v1991_v58  ;;  %v3575_v11 = vunpack.i.h.bf16 %v3573_v7  ;;  %v3574_v12 = vunpack.i.l.bf16 %v3573_v7  ;;  %v3820_v58 = vld [vmem:[%s4818_s4 + $0x20] ss:$8 sps:$4 sm:$0xff]   ;;  %v3825_v7 = vld [vmem:[%s4818_s4 + $0x14] ss:$8 sps:$4 sm:$0xff]  }
 0x4df   : > { %2017 = vmatpush1.bf16.msra.mxu0 %v1990_v61  ;;  %v3603_v13 = vpop.permute.xlu0 %3602  ;;  %v2060_v46 = vsel %vm2057_vm0, %v3599_v57, %v3569_v5  ;;  %v2061_v14 = vsel %vm2057_vm0, %v3600_v6, %v3570_v62  ;;  %v2062_v53 = vpack.c.bf16 %v2059_v9, %v2058_v8  ;;  %v3810_v61 = vld [vmem:[%s4818_s4 + $0x64] ss:$8 sps:$4 sm:$0xff]   ;;  %v3811_v62 = vld [vmem:[%s4818_s4 + $0x50] ss:$8 sps:$4 sm:$0xff]   ;;  %v3819_v5 = vld [vmem:[%s4818_s4 + $0x34] ss:$8 sps:$4 sm:$0xff]  }
 0x4e0   : > { %v3605_v52 = vunpack.i.h.bf16 %v3603_v13  ;;  %v3604_v15 = vunpack.i.l.bf16 %v3603_v13  ;;  %v2063_v20 = vpack.c.bf16 %v2061_v14, %v2060_v46  ;;  %v3817_v6 = vld [vmem:[%s4818_s4 + $0x30] ss:$8 sps:$4 sm:$0xff]   ;;  %v3822_v57 = vld [vmem:[%s4818_s4 + $0x24] ss:$8 sps:$4 sm:$0xff]   ;;  %v3832_v13 = vld [vmem:[%s4818_s4 + $0xe0] ss:$8 sps:$4 sm:$0xff]  }
 0x4e1   : > { %v3578_v21 = vpop.permute.xlu1 %3577  ;;  %v3823_v8 = vld [vmem:[%s4818_s4 + $0x10] ss:$8 sps:$4 sm:$0xff]   ;;  %v3828_v9 = vld [vmem:[%s4818_s4 + $0x4] ss:$8 sps:$4 sm:$0xff]   ;;  %v3837_v46 = vld [vmem:[%s4818_s4 + $0xd4] ss:$8 sps:$4 sm:$0xff]  }
 0x4e2   : > { %v2130_v22 = vsel %vm2129_vm2, %v3574_v12, %v3604_v15  ;;  %v2131_v23 = vsel %vm2129_vm2, %v3575_v11, %v3605_v52  ;;  %3355 = vmatmul.mubr.msk.bf16.vlgmr.msra.gmra.mxu1 %vm1807_vm12, %v3799_v45  ;;  %3357 = vmatmul.mubr.msk.bf16.vlgmr.msra.gmra.mxu0 %vm1807_vm12, %v3800_v10  ;;  %v3580_v28 = vunpack.i.h.bf16 %v3578_v21  ;;  %v2132_v30 = vsel %vm2129_vm2, %v3604_v15, %v3574_v12  ;;  %v3826_v45 = vld [vmem:[%s4818_s4] ss:$8 sps:$4 sm:$0xff]   ;;  %v3831_v10 = vld [vmem:[%s4818_s4 + $0xf4] ss:$8 sps:$4 sm:$0xff]   ;;  %v3834_v12 = vld [vmem:[%s4818_s4 + $0xe4] ss:$8 sps:$4 sm:$0xff]  }
 0x4e3   : > { %v2134_v27 = vpack.c.bf16 %v2131_v23, %v2130_v22  ;;  %2088 = vmatprep.subr.bf16.mxu1 %v2063_v20  ;;  %v3608_v29 = vpop.permute.xlu0 %3607  ;;  %v2133_v1 = vsel %vm2129_vm2, %v3605_v52, %v3575_v11  ;;  %2106 = vmatprep.mubr.bf16.mxu1 %v3911_v0  ;;  %v3579_v3 = vunpack.i.l.bf16 %v3578_v21  ;;  %v3829_v11 = vld [vmem:[%s4818_s4 + $0xf0] ss:$8 sps:$4 sm:$0xff]   ;;  %v3838_v52 = vld [vmem:[%s4818_s4 + $0xc0] ss:$8 sps:$4 sm:$0xff]   ;;  %v3843_v15 = vld [vmem:[%s4818_s4 + $0xb4] ss:$8 sps:$4 sm:$0xff]  }
 0x4e4   : > { %2089 = vmatpush1.bf16.msra.mxu1 %v2062_v53  ;;  %v3610_v31 = vunpack.i.h.bf16 %v3608_v29  ;;  %v3609_v32 = vunpack.i.l.bf16 %v3608_v29  ;;  %v2135_v16 = vpack.c.bf16 %v2133_v1, %v2132_v30  ;;  %2178 = vmatprep.mubr.bf16.mxu0 %v3911_v0  ;;  %v3835_v14 = vld [vmem:[%s4818_s4 + $0xd0] ss:$8 sps:$4 sm:$0xff]   ;;  %v3840_v53 = vld [vmem:[%s4818_s4 + $0xc4] ss:$8 sps:$4 sm:$0xff]   ;;  %v3844_v22 = vld [vmem:[%s4818_s4 + $0xa0] ss:$8 sps:$4 sm:$0xff]  }
 0x4e5   : > { %v3583_v17 = vpop.permute.xlu1 %3582  ;;  %v3841_v20 = vld [vmem:[%s4818_s4 + $0xb0] ss:$8 sps:$4 sm:$0xff]   ;;  %v3846_v21 = vld [vmem:[%s4818_s4 + $0xa4] ss:$8 sps:$4 sm:$0xff]   ;;  %v3849_v23 = vld [vmem:[%s4818_s4 + $0x94] ss:$8 sps:$4 sm:$0xff]  }
 0x4e6   : > { %v2202_v49 = vsel %vm2201_vm3, %v3579_v3, %v3609_v32  ;;  %v2203_v33 = vsel %vm2201_vm3, %v3580_v28, %v3610_v31  ;;  %2160 = vmatprep.subr.bf16.mxu0 %v2135_v16  ;;  %v3585_v19 = vunpack.i.h.bf16 %v3583_v17  ;;  %v3584_v35 = vunpack.i.l.bf16 %v3583_v17  ;;  %v3852_v29 = vld [vmem:[%s4818_s4 + $0x84] ss:$8 sps:$4 sm:$0xff]  }
 0x4e7   : > { %2161 = vmatpush1.bf16.msra.mxu0 %v2134_v27  ;;  %v3613_v36 = vpop.permute.xlu0 %3612  ;;  %v2204_v37 = vsel %vm2201_vm3, %v3609_v32, %v3579_v3  ;;  %v2205_v38 = vsel %vm2201_vm3, %v3610_v31, %v3580_v28  ;;  %v2206_v39 = vpack.c.bf16 %v2203_v33, %v2202_v49  ;;  %v3847_v27 = vld [vmem:[%s4818_s4 + $0x90] ss:$8 sps:$4 sm:$0xff]   ;;  %v3850_v28 = vld [vmem:[%s4818_s4 + $0x80] ss:$8 sps:$4 sm:$0xff]  }
 0x4e8   : > { %v3615_v40 = vunpack.i.h.bf16 %v3613_v36  ;;  %v3614_v41 = vunpack.i.l.bf16 %v3613_v36  ;;  %v2207_v42 = vpack.c.bf16 %v2205_v38, %v2204_v37 }
 0x4ea   : > { %v2274_v44 = vsel %vm2273_vm4, %v3584_v35, %v3614_v41  ;;  %v2275_v47 = vsel %vm2273_vm4, %v3585_v19, %v3615_v40  ;;  %3359 = vmatmul.mubr.msk.bf16.vlgmr.msra.gmra.mxu1 %vm1807_vm12, %v3801_v34  ;;  %3361 = vmatmul.mubr.msk.bf16.vlgmr.msra.gmra.mxu0 %vm1807_vm12, %v3802_v18  ;;  %v2276_v48 = vsel %vm2273_vm4, %v3614_v41, %v3584_v35 }
 0x4eb   : > { %v2278_v50 = vpack.c.bf16 %v2275_v47, %v2274_v44  ;;  %2232 = vmatprep.subr.bf16.mxu1 %v2207_v42  ;;  %v2277_v51 = vsel %vm2273_vm4, %v3615_v40, %v3585_v19  ;;  %2250 = vmatprep.mubr.bf16.mxu1 %v3911_v0 }
 0x4ec   : > { %2233 = vmatpush1.bf16.msra.mxu1 %v2206_v39  ;;  %v2279_v54 = vpack.c.bf16 %v2277_v51, %v2276_v48  ;;  %2322 = vmatprep.mubr.bf16.mxu0 %v3911_v0 }
 0x4ed   : > { %2575 = vmatprep.subr.bf16.mxu1 %v3807_v43 }
 0x4ee   : > { %2304 = vmatprep.subr.bf16.mxu0 %v2279_v54 }
 0x4ef   : > { %2305 = vmatpush1.bf16.msra.mxu0 %v2278_v50 }
 0x4f2   : > { %3363 = vmatmul.mubr.msk.bf16.vlgmr.msra.gmra.mxu1 %vm1807_vm12, %v3803_v55  ;;  %3365 = vmatmul.mubr.msk.bf16.vlgmr.msra.gmra.mxu0 %vm1807_vm12, %v3804_v56 }
 0x4f3   : > { %2576 = vmatpush1.bf16.msra.mxu1 %v3805_v59  ;;  %2678 = vmatprep.mubr.bf16.mxu0 %v3911_v0 }
 0x4f4   : > { %2577 = vmatprep.subr.bf16.mxu1 %v3810_v61 }
 0x4f7   : > { %2578 = vmatpush1.bf16.msra.mxu1 %v3808_v60 }
 0x4f8   : > { %2579 = vmatprep.subr.bf16.mxu1 %v3813_v63 }
 0x4fb   : > { %2580 = vmatpush1.bf16.msra.mxu1 %v3811_v62 }
 0x4fc   : > { %2581 = vmatprep.subr.bf16.mxu1 %v3816_v2 }
 0x4ff   : > { %2582 = vmatpush1.bf16.msra.mxu1 %v3814_v4 }
 0x500   : > { %2583 = vmatprep.subr.bf16.mxu1 %v3819_v5 }
 0x503   : > { %2584 = vmatpush1.bf16.msra.mxu1 %v3817_v6 }
 0x504   : > { %2585 = vmatprep.subr.bf16.mxu1 %v3822_v57 }
 0x507   : > { %2586 = vmatpush1.bf16.msra.mxu1 %v3820_v58 }
 0x508   : > { %2587 = vmatprep.subr.bf16.mxu1 %v3825_v7 }
 0x50b   : > { %2588 = vmatpush1.bf16.msra.mxu1 %v3823_v8 }
 0x50c   : > { %2589 = vmatprep.subr.bf16.mxu1 %v3828_v9 }
 0x50f   : > { %2590 = vmatpush1.bf16.msra.mxu1 %v3826_v45 }
 0x510   : > { %2591 = vmatprep.subr.bf16.mxu1 %v3831_v10  ;;  %v2339_v10 = vpop.permute.xlu1 %2338 }
 0x513   : > { %2592 = vmatpush2.bf16.msra.mxu1 %v3829_v11 }
 0x514   : > { %2593 = vmatprep.subr.bf16.mxu1 %v3834_v12 }
 0x517   : > { %2594 = vmatpush2.bf16.msra.mxu1 %v3832_v13 }
 0x518   : > { %2595 = vmatprep.subr.bf16.mxu1 %v3837_v46 }
 0x51b   : > { %2596 = vmatpush2.bf16.msra.mxu1 %v3835_v14 }
 0x51c   : > { %2597 = vmatprep.subr.bf16.mxu1 %v3840_v53 }
 0x51f   : > { %2598 = vmatpush2.bf16.msra.mxu1 %v3838_v52 }
 0x520   : > { %2599 = vmatprep.subr.bf16.mxu1 %v3843_v15 }
 0x521   : > { %v1896_v30 = vpop.f32.mrf.mxu0 }
 0x523   : > { %2600 = vmatpush2.bf16.msra.mxu1 %v3841_v20  ;;  %v1898_v1 = vpop.f32.mrf.mxu0 }
 0x524   : > { %2601 = vmatprep.subr.bf16.mxu1 %v3846_v21 }
 0x525   : > { %v1900_v32 = vpop.f32.mrf.mxu0 }
 0x527   : > { %2602 = vmatpush2.bf16.msra.mxu1 %v3844_v22  ;;  %v1902_v49 = vpop.f32.mrf.mxu0 }
 0x528   : > { %2603 = vmatprep.subr.bf16.mxu1 %v3849_v23 }
 0x52b   : > { %2604 = vmatpush2.bf16.msra.mxu1 %v3847_v27 }
 0x52c   : > { %2605 = vmatprep.subr.bf16.mxu1 %v3852_v29 }
 0x52f   : > { %2606 = vmatpush2.bf16.msra.mxu1 %v3850_v28  ;;  %v2343_v28 = vpop.permute.xlu0 %2342 }
 0x59a   : > { %v1845_v3 = vpop.f32.mrf.mxu1 }
 0x59b   : > { %v1897_v35 = vadd.f32 %v1896_v30, %v1845_v3 }
 0x59c   : > { %v1847_v31 = vpop.f32.mrf.mxu1 }
 0x59d   : > { %v1899_v38 = vadd.f32 %v1898_v1, %v1847_v31 }
 0x59e   : > { %v1849_v16 = vpop.f32.mrf.mxu1 }
 0x59f   : > { %v1901_v42 = vadd.f32 %v1900_v32, %v1849_v16 }
 0x5a0   : > { %v1851_v17 = vpop.f32.mrf.mxu1 }
 0x5a1   : > { %v1903_v51 = vadd.f32 %v1902_v49, %v1851_v17 }
 0x5a2   : > { %v1964_v33 = vpop.f32.mrf.mxu1  ;;  %v2036_v34 = vpop.f32.mrf.mxu0 }
 0x5a3   : > { %v1973_v39 = vadd.f32 %v1964_v33, %v1897_v35 }
 0x5a4   : > { %v1966_v18 = vpop.f32.mrf.mxu1  ;;  %v2038_v19 = vpop.f32.mrf.mxu0 }
 0x5a5   : > { %v1974_v43 = vadd.f32 %v1966_v18, %v1899_v38  ;;  %v2045_v48 = vadd.f32 %v2036_v34, %v1973_v39 }
 0x5a6   : > { %v1968_v36 = vpop.f32.mrf.mxu1  ;;  %v2040_v37 = vpop.f32.mrf.mxu0 }
 0x5a7   : > { %v1975_v50 = vadd.f32 %v1968_v36, %v1901_v42  ;;  %v2046_v56 = vadd.f32 %v2038_v19, %v1974_v43 }
 0x5a8   : > { %v1970_v40 = vpop.f32.mrf.mxu1  ;;  %v2042_v41 = vpop.f32.mrf.mxu0 }
 0x5a9   : > { %v1976_v60 = vadd.f32 %v1970_v40, %v1903_v51  ;;  %v2047_v63 = vadd.f32 %v2040_v37, %v1975_v50 }
 0x5aa   : > { %v2108_v44 = vpop.f32.mrf.mxu1  ;;  %v2180_v47 = vpop.f32.mrf.mxu0 }
 0x5ab   : > { %v2117_v59 = vadd.f32 %v2108_v44, %v2045_v48  ;;  %v2048_v58 = vadd.f32 %v2042_v41, %v1976_v60 }
 0x5ac   : > { %v2110_v54 = vpop.f32.mrf.mxu1  ;;  %v2182_v55 = vpop.f32.mrf.mxu0 }
 0x5ad   : > { %v2118_v2 = vadd.f32 %v2110_v54, %v2046_v56  ;;  %v2189_v6 = vadd.f32 %v2180_v47, %v2117_v59 }
 0x5ae   : > { %v2112_v61 = vpop.f32.mrf.mxu1  ;;  %v2184_v62 = vpop.f32.mrf.mxu0 }
 0x5af   : > { %v2119_v57 = vadd.f32 %v2112_v61, %v2047_v63  ;;  %v2190_v9 = vadd.f32 %v2182_v55, %v2118_v2 }
 0x5b0   : > { %v2114_v4 = vpop.f32.mrf.mxu1  ;;  %v2186_v5 = vpop.f32.mrf.mxu0 }
 0x5b1   : > { %v2120_v11 = vadd.f32 %v2114_v4, %v2048_v58  ;;  %v2191_v46 = vadd.f32 %v2184_v62, %v2119_v57 }
 0x5b2   : > { %v2252_v7 = vpop.f32.mrf.mxu1  ;;  %v2324_v8 = vpop.f32.mrf.mxu0 }
 0x5b3   : > { %v2261_v45 = vadd.f32 %v2252_v7, %v2189_v6  ;;  %v2192_v23 = vadd.f32 %v2186_v5, %v2120_v11 }
 0x5b4   : > { %v2254_v12 = vpop.f32.mrf.mxu1  ;;  %v2326_v13 = vpop.f32.mrf.mxu0 }
 0x5b5   : > { %v2333_v14 = vadd.f32 %v2324_v8, %v2261_v45  ;;  %v2262_v53 = vadd.f32 %v2254_v12, %v2190_v9 }
 0x5b6   : > { %v2256_v52 = vpop.f32.mrf.mxu1  ;;  %v2328_v22 = vpop.f32.mrf.mxu0 }
 0x5b7   : > { %v2334_v15 = vadd.f32 %v2326_v13, %v2262_v53  ;;  %v2345_v20 = vadd.f32 %v2339_v10, %v2333_v14  ;;  %v2263_v21 = vadd.f32 %v2256_v52, %v2191_v46 }
 0x5b8   : > { %v2258_v27 = vpop.f32.mrf.mxu1  ;;  %v2330_v16 = vpop.f32.mrf.mxu0 }
 0x5b9   : > { %v2346_v29 = vadd.f32 %v2339_v10, %v2334_v15  ;;  %v2349_v30 = vand.u32 2147483647, %v2345_v20  ;;  %v2335_v1 = vadd.f32 %v2328_v22, %v2263_v21  ;;  %v2264_v3 = vadd.f32 %v2258_v27, %v2192_v23 }
 0x5ba   : > { %vm2365_vm8 = vcmp.ge.f32.partialorder %v2345_v20, 0.0  ;;  %v3924_v10 = vmov 3  }
 0x5bb   : > { %v2350_v31 = vand.u32 2147483647, %v2346_v29  ;;  %v2353_v32 = vsub.f32 0.0, %v2349_v30  ;;  %v2347_v17 = vadd.f32 %v2343_v28, %v2335_v1  ;;  %v2336_v49 = vadd.f32 %v2330_v16, %v2264_v3  ;;  %3648 = vset.pattern.permute.xlu0 %v3924_v10  ;;  %3649 = vset.pattern.permute.xlu1 %v3924_v10  ;;  %v3853_v1 = vld [vmem:[%s4816_s2 + $0x48] sm:$0xff]   ;;  %v3034_v10 = vld [vmem:[%s4821_s7 + $0x20] sm:$0xff] }
 0x5bc   : > { %vm2366_vm6 = vcmp.ge.f32.partialorder %v2346_v29, 0.0 }
 0x5bd   : > { %v2354_v33 = vsub.f32 0.0, %v2350_v31  ;;  %v2357_v34 = vmul.f32 1.442695, %v2353_v32  ;;  %v2351_v18 = vand.u32 2147483647, %v2347_v17  ;;  %v2348_v19 = vadd.f32 %v2343_v28, %v2336_v49 }
 0x5be   : > { %vm2367_vm5 = vcmp.ge.f32.partialorder %v2347_v17, 0.0 }
 0x5bf   : > { %v2359_v35 = vmul.f32 1.442695, %v2354_v33  ;;  %v2355_v36 = vsub.f32 0.0, %v2351_v18  ;;  %v2352_v37 = vand.u32 2147483647, %v2348_v19  ;;  %3881 = vpow2.f32 %v2357_v34 }
 0x5c0   : > { %vm2368_vm7 = vcmp.ge.f32.partialorder %v2348_v19, 0.0 }
 0x5c1   : > { %v2361_v38 = vmul.f32 1.442695, %v2355_v36  ;;  %3883 = vpow2.f32 %v2359_v35  ;;  %v2356_v39 = vsub.f32 0.0, %v2352_v37  ;;  %v3854_v36 = vld [vmem:[%s4816_s2 + $0x40] sm:$0xff]  }
 0x5c3   : > { %3885 = vpow2.f32 %v2361_v38  ;;  %v2363_v40 = vmul.f32 1.442695, %v2356_v39 }
 0x5c5   : > { %3887 = vpow2.f32 %v2363_v40 }
 0x5cc   : > { %v3882_v41 = vpop.eup %3881 }
 0x5cd   : > { %v2369_v54 = vsub.f32 1.0, %v3882_v41  ;;  %v3366_v55 = vadd.f32 -1.0, %v3882_v41 }
 0x5ce   : > { %v3884_v42 = vpop.eup %3883 }
 0x5cf   : > { %v2370_v48 = vsub.f32 1.0, %v3884_v42  ;;  %v3367_v50 = vadd.f32 -1.0, %v3884_v42  ;;  %v2377_v63 = vsel %vm2365_vm8, %v2369_v54, %v3366_v55  ;;  %v3043_v54 = vld [vmem:[%s4821_s7 + $0x68] sm:$0xff]  ;;  %v3058_v55 = vld [vmem:[%s4821_s7 + $0xe0] sm:$0xff] }
 0x5d0   : > { %v3886_v43 = vpop.eup %3885 }
 0x5d1   : > { %v2371_v44 = vsub.f32 1.0, %v3886_v43  ;;  %v3368_v47 = vadd.f32 -1.0, %v3886_v43  ;;  %v2378_v61 = vsel %vm2366_vm6, %v2370_v48, %v3367_v50  ;;  %v3855_v43 = vld [vmem:[%s4816_s2 + $0x50] sm:$0xff]   ;;  %v3045_v48 = vld [vmem:[%s4821_s7 + $0x78] sm:$0xff] }
 0x5d2   : > { %v3888_v51 = vpop.eup %3887  ;;  %v3044_v50 = vld [vmem:[%s4821_s7 + $0x70] sm:$0xff] }
 0x5d3   : > { %v2372_v56 = vsub.f32 1.0, %v3888_v51  ;;  %v3369_v59 = vadd.f32 -1.0, %v3888_v51  ;;  %v2379_v60 = vsel %vm2367_vm5, %v2371_v44, %v3368_v47  ;;  %v3856_v47 = vld [vmem:[%s4816_s2 + $0x58] sm:$0xff]   ;;  %v3059_v51 = vld [vmem:[%s4821_s7 + $0xe8] sm:$0xff] }
 0x5d4   : > { %v2381_v4 = vpack.c.bf16 %v2379_v60, %v2377_v63  ;;  %v3041_v60 = vld [vmem:[%s4821_s7 + $0x58] sm:$0xff]  ;;  %v3055_v63 = vld [vmem:[%s4821_s7 + $0xc8] sm:$0xff] }
 0x5d5   : > { %v2380_v62 = vsel %vm2368_vm7, %v2372_v56, %v3369_v59  ;;  %v3042_v56 = vld [vmem:[%s4821_s7 + $0x60] sm:$0xff]  ;;  %v3057_v59 = vld [vmem:[%s4821_s7 + $0xd8] sm:$0xff] }
 0x5d6   : > { %v2382_v2 = vpack.c.bf16 %v2380_v62, %v2378_v61  ;;  %v3056_v61 = vld [vmem:[%s4821_s7 + $0xd0] sm:$0xff] }
 0x5d7   : > { %v3040_v62 = vld [vmem:[%s4821_s7 + $0x50] sm:$0xff] }
 0x5d8   : > { %2607 = vmatprep.mubr.bf16.mxu1 %v2382_v2  ;;  %v3039_v2 = vld [vmem:[%s4821_s7 + $0x48] sm:$0xff] }
 0x5d9   : > { %2608 = vmatmul.mubr.bf16.vlgmr.msra.gmra.mxu1 %v2381_v4  ;;  %v3054_v4 = vld [vmem:[%s4821_s7 + $0xc0] sm:$0xff] }
 0x699   : > { %v2609_v5 = vpop.f32.mrf.mxu1 }
 0x69b   : > { %v2611_v6 = vpop.f32.mrf.mxu1 }
 0x69d   : > { %v2613_v57 = vpop.f32.mrf.mxu1 }
 0x69e   : > { %v2620_v58 = vpack.c.bf16 %v2613_v57, %v2609_v5  ;;  %v3628_v7 = vpack.i.bf16 %v2613_v57, %v2609_v5  ;;  %v3038_v5 = vld [vmem:[%s4821_s7 + $0x40] sm:$0xff]  ;;  %v3037_v57 = vld [vmem:[%s4821_s7 + $0x38] sm:$0xff] }
 0x69f   : > { %v2615_v8 = vpop.f32.mrf.mxu1 }
 0x6a0   : > { %v2621_v9 = vpack.c.bf16 %v2615_v8, %v2611_v6  ;;  %3629 = vrot.lane.b32.xlu0 %v3628_v7, %s3917_s24  ;;  %3619 = vrot.lane.b32.xlu1 %v3628_v7, %s3916_s21  ;;  %v3623_v45 = vpack.i.bf16 %v2615_v8, %v2611_v6  ;;  %v3053_v6 = vld [vmem:[%s4821_s7 + $0xb8] sm:$0xff]  ;;  %v3051_v8 = vld [vmem:[%s4821_s7 + $0xa8] sm:$0xff] }
 0x6a4   : > { %3639 = vrot.lane.b32.xlu0 %v3628_v7, %s3918_s25  ;;  %3624 = vrot.lane.b32.xlu1 %v3623_v45, %s3916_s21  ;;  %v3036_v7 = vld [vmem:[%s4821_s7 + $0x30] sm:$0xff] }
 0x6a8   : > { %3634 = vrot.lane.b32.xlu1 %v3623_v45, %s3917_s24  ;;  %2883 = vperm.xlu0 %3648, %v4419_v24  }
 0x6ac   : > { %3644 = vrot.lane.b32.xlu1 %v3623_v45, %s3918_s25  ;;  %v3050_v45 = vld [vmem:[%s4821_s7 + $0xa0] sm:$0xff] }
 0x6b0   : > { %2887 = vperm.xlu1 %3649, %v4425_v25  }
 0x712   : > { %v3620_v11 = vpop.permute.xlu1 %3619  ;;  %v3630_v52 = vpop.permute.xlu0 %3629 }
 0x713   : > { %v3622_v13 = vunpack.i.h.bf16 %v3620_v11  ;;  %v3621_v46 = vunpack.i.l.bf16 %v3620_v11  ;;  %v3632_v27 = vunpack.i.h.bf16 %v3630_v52  ;;  %v3631_v28 = vunpack.i.l.bf16 %v3630_v52  ;;  %v3049_v11 = vld [vmem:[%s4821_s7 + $0x98] sm:$0xff]  ;;  %v3046_v52 = vld [vmem:[%s4821_s7 + $0x80] sm:$0xff] }
 0x716   : > { %v3625_v12 = vpop.permute.xlu1 %3624  ;;  %v3640_v16 = vpop.permute.xlu0 %3639 }
 0x717   : > { %v3627_v14 = vunpack.i.h.bf16 %v3625_v12  ;;  %v3626_v53 = vunpack.i.l.bf16 %v3625_v12  ;;  %v3642_v34 = vunpack.i.h.bf16 %v3640_v16  ;;  %v3641_v18 = vunpack.i.l.bf16 %v3640_v16  ;;  %v3033_v12 = vld [vmem:[%s4821_s7 + $0x18] sm:$0xff] }
 0x719   : > { %v2631_v15 = vsel %vm1793_vm13, %v3622_v13, %v3627_v14  ;;  %v2630_v20 = vsel %vm1793_vm13, %v3621_v46, %v3626_v53  ;;  %v2632_v21 = vsel %vm1793_vm13, %v3626_v53, %v3621_v46  ;;  %v2633_v24 = vsel %vm1793_vm13, %v3627_v14, %v3622_v13  ;;  %v3048_v13 = vld [vmem:[%s4821_s7 + $0x90] sm:$0xff]  ;;  %v3047_v14 = vld [vmem:[%s4821_s7 + $0x88] sm:$0xff] }
 0x71a   : > { %v2634_v25 = vpack.c.bf16 %v2631_v15, %v2630_v20  ;;  %v3635_v22 = vpop.permute.xlu1 %3634  ;;  %v2635_v23 = vpack.c.bf16 %v2633_v24, %v2632_v21  ;;  %v3032_v46 = vld [vmem:[%s4821_s7 + $0x10] sm:$0xff]  ;;  %v3031_v53 = vld [vmem:[%s4821_s7 + $0x8] sm:$0xff]  ;;  %v3030_v15 = vld [vmem:[%s4821_s7] sm:$0xff]  ;;  %v3925_v21 = vmov 4   ;;  %vm3022_vm13 = vcmask 1040384  }
 0x71b   : > { %v3637_v29 = vunpack.i.h.bf16 %v3635_v22  ;;  %v3636_v30 = vunpack.i.l.bf16 %v3635_v22  ;;  %v317_v20 = vld [vmem:[%s4820_s6] sm:$0xf]  ;;  %3650 = vset.pattern.permute.xlu1 %v3925_v21  ;;  %3651 = vset.pattern.permute.xlu0 %v3925_v21 }
 0x71c   : > { %2660 = vmatprep.subr.bf16.mxu0 %v2635_v23  ;;  %3064 = vperm.xlu1 %3650, %v317_v20   ;;  %v2999_v20 = vld [vmem:[%s4818_s4 + $0x138] sm:$0xff] }
 0x71d   : > { %2661 = vmatpush1.bf16.msra.mxu0 %v2634_v25  ;;  %v2750_v3 = vsel %vm1913_vm14, %v3636_v30, %v3631_v28  ;;  %v2751_v31 = vsel %vm1913_vm14, %v3637_v29, %v3632_v27  ;;  %v2749_v19 = vsel %vm1913_vm14, %v3632_v27, %v3637_v29  ;;  %v2748_v35 = vsel %vm1913_vm14, %v3631_v28, %v3636_v30 }
 0x71e   : > { %v3645_v32 = vpop.permute.xlu1 %3644  ;;  %2711 = vmatprep.subr.bf16.mxu0 %v2621_v9  ;;  %v2753_v17 = vpack.c.bf16 %v2751_v31, %v2750_v3  ;;  %v2752_v39 = vpack.c.bf16 %v2749_v19, %v2748_v35  ;;  %v3035_v9 = vld [vmem:[%s4821_s7 + $0x28] sm:$0xff]  ;;  %vm3027_vm14 = vcmask 1042432  }
 0x71f   : > { %v3647_v49 = vunpack.i.h.bf16 %v3645_v32  ;;  %v3646_v33 = vunpack.i.l.bf16 %v3645_v32 }
 0x720   : > { %3403 = vmatmul.mubr.msk.bf16.vlgmr.msra.gmra.mxu0 %vm1807_vm12, %v3853_v1 }
 0x721   : > { %2712 = vmatpush1.bf16.msra.mxu0 %v2620_v58  ;;  %2729 = vmatprep.mubr.bf16.mxu0 %v3911_v0  ;;  %v2821_v37 = vsel %vm1985_vm15, %v3646_v33, %v3641_v18  ;;  %v2822_v38 = vsel %vm1985_vm15, %v3647_v49, %v3642_v34  ;;  %v2820_v41 = vsel %vm1985_vm15, %v3642_v34, %v3647_v49  ;;  %v3052_v58 = vld [vmem:[%s4821_s7 + $0xb0] sm:$0xff] }
 0x722   : > { %2778 = vmatprep.subr.bf16.mxu0 %v2753_v17  ;;  %v2824_v40 = vpack.c.bf16 %v2822_v38, %v2821_v37  ;;  %v2819_v42 = vsel %vm1985_vm15, %v3641_v18, %v3646_v33  ;;  %vm3137_vm15 = vcmask 11264  }
 0x723   : > { %v2823_v44 = vpack.c.bf16 %v2820_v41, %v2819_v42  ;;  %v2884_v34 = vpop.permute.xlu0 %2883 }
 0x728   : > { %3405 = vmatmul.mubr.msk.bf16.vlgmr.msra.gmra.mxu0 %vm1807_vm12, %v3854_v36 }
 0x729   : > { %2779 = vmatpush1.bf16.msra.mxu0 %v2752_v39  ;;  %2796 = vmatprep.mubr.bf16.mxu0 %v3911_v0 }
 0x72a   : > { %2849 = vmatprep.subr.bf16.mxu0 %v2824_v40 }
 0x72b   : > { %v2888_v42 = vpop.permute.xlu1 %2887 }
 0x730   : > { %3407 = vmatmul.mubr.msk.bf16.vlgmr.msra.gmra.mxu0 %vm1807_vm12, %v3855_v43 }
 0x731   : > { %2850 = vmatpush1.bf16.msra.mxu0 %v2823_v44  ;;  %2867 = vmatprep.mubr.bf16.mxu0 %v3911_v0  ;;  %v3060_v0 = vld [vmem:[%s4821_s7 + $0xf0] sm:$0xff] }
 0x732   : > { %3476 = vmatprep.subr.mxu0 %v3061_v26 }
 0x738   : > { %3409 = vmatmul.mubr.msk.bf16.vlgmr.msra.gmra.mxu0 %vm1807_vm12, %v3856_v47 }
 0x739   : > { %3477 = vmatpush3.msra.mxu0 %v3045_v48 }
 0x73a   : > { %3478 = vmatprep.subr.mxu0 %v3060_v0 }
 0x73b   : > { %3479 = vmatpush3.msra.mxu0 %v3044_v50 }
 0x73c   : > { %3480 = vmatprep.subr.mxu0 %v3059_v51 }
 0x73d   : > { %3481 = vmatpush3.msra.mxu0 %v3043_v54 }
 0x73e   : > { %3482 = vmatprep.subr.mxu0 %v3058_v55 }
 0x73f   : > { %3483 = vmatpush3.msra.mxu0 %v3042_v56 }
 0x740   : > { %3484 = vmatprep.subr.mxu0 %v3057_v59 }
 0x741   : > { %3485 = vmatpush3.msra.mxu0 %v3041_v60 }
 0x742   : > { %3486 = vmatprep.subr.mxu0 %v3056_v61 }
 0x743   : > { %3487 = vmatpush3.msra.mxu0 %v3040_v62 }
 0x744   : > { %3488 = vmatprep.subr.mxu0 %v3055_v63 }
 0x745   : > { %3489 = vmatpush3.msra.mxu0 %v3039_v2 }
 0x746   : > { %3490 = vmatprep.subr.mxu0 %v3054_v4 }
 0x747   : > { %3491 = vmatpush3.msra.mxu0 %v3038_v5 }
 0x748   : > { %3492 = vmatprep.subr.mxu0 %v3053_v6  ;;  %v2926_v6 = vld [vmem:[%s4818_s4 + $0x100] sm:$0xff] }
 0x749   : > { %3493 = vmatpush3.msra.mxu0 %v3037_v57  ;;  %v2950_v57 = vld [vmem:[%s4818_s4 + $0x110] sm:$0xff] }
 0x74a   : > { %3494 = vmatprep.subr.mxu0 %v3052_v58  ;;  %v2974_v58 = vld [vmem:[%s4818_s4 + $0x120] sm:$0xff] }
 0x74b   : > { %3495 = vmatpush3.msra.mxu0 %v3036_v7  ;;  %v2998_v7 = vld [vmem:[%s4818_s4 + $0x130] sm:$0xff] }
 0x74c   : > { %3496 = vmatprep.subr.mxu0 %v3051_v8  ;;  %v2927_v8 = vld [vmem:[%s4818_s4 + $0x108] sm:$0xff] }
 0x74d   : > { %3497 = vmatpush3.msra.mxu0 %v3035_v9 }
 0x74e   : > { %3498 = vmatprep.subr.mxu0 %v3050_v45  ;;  %v2928_v45 = vunpack.c.l.bf16 %v2926_v6 }
 0x74f   : > { %3499 = vmatpush3.msra.mxu0 %v3034_v10  ;;  %v2952_v10 = vunpack.c.l.bf16 %v2950_v57 }
 0x750   : > { %3500 = vmatprep.subr.mxu0 %v3049_v11  ;;  %v2976_v11 = vunpack.c.l.bf16 %v2974_v58 }
 0x751   : > { %3501 = vmatpush3.msra.mxu0 %v3033_v12  ;;  %v3000_v12 = vunpack.c.l.bf16 %v2998_v7 }
 0x752   : > { %3502 = vmatprep.subr.mxu0 %v3048_v13  ;;  %v2951_v13 = vld [vmem:[%s4818_s4 + $0x118] sm:$0xff] }
 0x753   : > { %3503 = vmatpush3.msra.mxu0 %v3032_v46 }
 0x754   : > { %3504 = vmatprep.subr.mxu0 %v3047_v14 }
 0x755   : > { %3505 = vmatpush3.msra.mxu0 %v3031_v53  ;;  %v2929_v53 = vunpack.c.h.bf16 %v2926_v6 }
 0x756   : > { %3506 = vmatprep.subr.mxu0 %v3046_v52  ;;  %v2953_v52 = vunpack.c.h.bf16 %v2950_v57 }
 0x757   : > { %3507 = vmatpush3.msra.mxu0 %v3030_v15  ;;  %v2975_v15 = vld [vmem:[%s4818_s4 + $0x128] sm:$0xff] }
 0x7e0   : > { %v2680_v24 = vpop.f32.mrf.mxu0 }
 0x7e2   : > { %v2682_v25 = vpop.f32.mrf.mxu0 }
 0x7e4   : > { %v2684_v22 = vpop.f32.mrf.mxu0 }
 0x7e6   : > { %v2686_v23 = vpop.f32.mrf.mxu0 }
 0x7e8   : > { %v2731_v27 = vpop.f32.mrf.mxu0 }
 0x7e9   : > { %v2732_v32 = vadd.f32 %v2731_v27, %v2680_v24  ;;  %v2977_v24 = vunpack.c.h.bf16 %v2974_v58 }
 0x7ea   : > { %v2733_v28 = vpop.f32.mrf.mxu0 }
 0x7eb   : > { %v2734_v17 = vadd.f32 %v2733_v28, %v2682_v25  ;;  %v3001_v25 = vunpack.c.h.bf16 %v2998_v7 }
 0x7ec   : > { %v2735_v29 = vpop.f32.mrf.mxu0 }
 0x7ed   : > { %v2736_v18 = vadd.f32 %v2735_v29, %v2684_v22  ;;  %v2930_v22 = vunpack.c.l.bf16 %v2927_v8  ;;  %v2954_v29 = vunpack.c.l.bf16 %v2951_v13 }
 0x7ee   : > { %v2737_v30 = vpop.f32.mrf.mxu0 }
 0x7ef   : > { %v2738_v40 = vadd.f32 %v2737_v30, %v2686_v23 }
 0x7f0   : > { %v2798_v1 = vpop.f32.mrf.mxu0 }
 0x7f1   : > { %v2807_v49 = vadd.f32 %v2798_v1, %v2732_v32  ;;  %v2978_v1 = vunpack.c.l.bf16 %v2975_v15  ;;  %v2955_v32 = vunpack.c.h.bf16 %v2951_v13 }
 0x7f2   : > { %v2800_v3 = vpop.f32.mrf.mxu0 }
 0x7f3   : > { %v2808_v19 = vadd.f32 %v2800_v3, %v2734_v17  ;;  %v3002_v3 = vunpack.c.l.bf16 %v2999_v20 }
 0x7f4   : > { %v2802_v31 = vpop.f32.mrf.mxu0 }
 0x7f5   : > { %v2809_v37 = vadd.f32 %v2802_v31, %v2736_v18  ;;  %v2931_v31 = vunpack.c.h.bf16 %v2927_v8  ;;  %v3003_v18 = vunpack.c.h.bf16 %v2999_v20 }
 0x7f6   : > { %v2804_v16 = vpop.f32.mrf.mxu0 }
 0x7f7   : > { %v2810_v26 = vadd.f32 %v2804_v16, %v2738_v40 }
 0x7f8   : > { %v2869_v33 = vpop.f32.mrf.mxu0 }
 0x7f9   : > { %v2878_v35 = vadd.f32 %v2869_v33, %v2807_v49  ;;  %v2979_v49 = vunpack.c.h.bf16 %v2975_v15 }
 0x7fa   : > { %v2871_v36 = vpop.f32.mrf.mxu0 }
 0x7fb   : > { %v2890_v38 = vadd.f32 %v2884_v34, %v2878_v35  ;;  %v2879_v39 = vadd.f32 %v2871_v36, %v2808_v19 }
 0x7fc   : > { %v2873_v41 = vpop.f32.mrf.mxu0 }
 0x7fd   : > { %v2894_v43 = vand.u32 2147483647, %v2890_v38  ;;  %v2891_v44 = vadd.f32 %v2884_v34, %v2879_v39  ;;  %v2880_v47 = vadd.f32 %v2873_v41, %v2809_v37  ;;  %vm2910_vm9 = vcmp.ge.f32.partialorder %v2890_v38, 0.0 }
 0x7fe   : > { %v2875_v48 = vpop.f32.mrf.mxu0 }
 0x7ff   : > { %v2898_v0 = vsub.f32 0.0, %v2894_v43  ;;  %v2895_v50 = vand.u32 2147483647, %v2891_v44  ;;  %v2892_v51 = vadd.f32 %v2888_v42, %v2880_v47  ;;  %v2881_v54 = vadd.f32 %v2875_v48, %v2810_v26 }
 0x800   : > { %vm2911_vm10 = vcmp.ge.f32.partialorder %v2891_v44, 0.0 }
 0x801   : > { %v2902_v55 = vmul.f32 1.442695, %v2898_v0  ;;  %v2899_v56 = vsub.f32 0.0, %v2895_v50  ;;  %v2896_v59 = vand.u32 2147483647, %v2892_v51  ;;  %v4774_v60 = vadd.f32 %v2888_v42, %v2881_v54 }
 0x802   : > { %vm2912_vm11 = vcmp.ge.f32.partialorder %v2892_v51, 0.0 }
 0x803   : > { %3889 = vpow2.f32 %v2902_v55  ;;  %v2904_v61 = vmul.f32 1.442695, %v2899_v56  ;;  %v2900_v62 = vsub.f32 0.0, %v2896_v59  ;;  %v2897_v63 = vand.u32 2147483647, %v4774_v60 }
 0x804   : > { %vm2913_vm12 = vcmp.ge.f32.partialorder %v4774_v60, 0.0 }
 0x805   : > { %3891 = vpow2.f32 %v2904_v61  ;;  %v2906_v2 = vmul.f32 1.442695, %v2900_v62  ;;  %v2901_v4 = vsub.f32 0.0, %v2897_v63 }
 0x807   : > { %3893 = vpow2.f32 %v2906_v2  ;;  %v2908_v5 = vmul.f32 1.442695, %v2901_v4 }
 0x809   : > { %3895 = vpow2.f32 %v2908_v5 }
 0x810   : > { %v3890_v9 = vpop.eup %3889 }
 0x811   : > { %v2914_v46 = vsub.f32 1.0, %v3890_v9  ;;  %v3410_v14 = vadd.f32 -1.0, %v3890_v9 }
 0x812   : > { %v3892_v21 = vpop.eup %3891 }
 0x813   : > { %v2922_v23 = vsel %vm2910_vm9, %v2914_v46, %v3410_v14  ;;  %v2915_v27 = vsub.f32 1.0, %v3892_v21  ;;  %v3411_v28 = vadd.f32 -1.0, %v3892_v21 }
 0x814   : > { %v3894_v30 = vpop.eup %3893  ;;  %v2932_v33 = vmul.f32 %v2928_v45, %v2922_v23  ;;  %v2956_v35 = vmul.f32 %v2952_v10, %v2922_v23  ;;  %v2980_v36 = vmul.f32 %v2976_v11, %v2922_v23  ;;  %v3004_v37 = vmul.f32 %v3000_v12, %v2922_v23 }
 0x815   : > { %v2916_v16 = vsub.f32 1.0, %v3894_v30  ;;  %v3412_v17 = vadd.f32 -1.0, %v3894_v30  ;;  %v2923_v34 = vsel %vm2911_vm10, %v2915_v27, %v3411_v28 }
 0x816   : > { %v3896_v19 = vpop.eup %3895  ;;  %v2933_v43 = vmul.f32 %v2929_v53, %v2923_v34  ;;  %v2957_v51 = vmul.f32 %v2953_v52, %v2923_v34  ;;  %v2981_v54 = vmul.f32 %v2977_v24, %v2923_v34  ;;  %v3005_v55 = vmul.f32 %v3001_v25, %v2923_v34 }
 0x817   : > { %v2924_v38 = vsel %vm2912_vm11, %v2916_v16, %v3412_v17  ;;  %v2917_v44 = vsub.f32 1.0, %v3896_v19  ;;  %v3413_v47 = vadd.f32 -1.0, %v3896_v19 }
 0x818   : > { %v2934_v39 = vmul.f32 %v2930_v22, %v2924_v38  ;;  %v2958_v40 = vmul.f32 %v2954_v29, %v2924_v38  ;;  %v2982_v41 = vmul.f32 %v2978_v1, %v2924_v38  ;;  %v3006_v42 = vmul.f32 %v3002_v3, %v2924_v38 }
 0x819   : > { %v2925_v56 = vsel %vm2913_vm12, %v2917_v44, %v3413_v47 }
 0x81a   : > { %v2936_v26 = vadd.f32 %v2934_v39, %v2932_v33  ;;  %v2960_v48 = vadd.f32 %v2958_v40, %v2956_v35  ;;  %v2984_v0 = vadd.f32 %v2982_v41, %v2980_v36  ;;  %v3008_v50 = vadd.f32 %v3006_v42, %v3004_v37 }
 0x81b   : > { %v2935_v63 = vmul.f32 %v2931_v31, %v2925_v56  ;;  %v2959_v2 = vmul.f32 %v2955_v32, %v2925_v56  ;;  %v2983_v4 = vmul.f32 %v2979_v49, %v2925_v56  ;;  %v3007_v5 = vmul.f32 %v3003_v18, %v2925_v56 }
 0x81c   : > { %v2937_v59 = vrot.slane %v2936_v26, 4  ;;  %v2961_v61 = vrot.slane %v2960_v48, 4  ;;  %v2985_v62 = vrot.slane %v2984_v0, 4  ;;  %v3009_v6 = vrot.slane %v3008_v50, 4 }
 0x81d   : > { %v2943_v7 = vadd.f32 %v2935_v63, %v2933_v43  ;;  %v2967_v8 = vadd.f32 %v2959_v2, %v2957_v51  ;;  %v2991_v9 = vadd.f32 %v2983_v4, %v2981_v54  ;;  %v3015_v45 = vadd.f32 %v3007_v5, %v3005_v55 }
 0x81e   : > { %v2938_v57 = vadd.f32 %v2937_v59, %v2936_v26  ;;  %v2962_v60 = vadd.f32 %v2961_v61, %v2960_v48  ;;  %v2986_v58 = vadd.f32 %v2985_v62, %v2984_v0  ;;  %v3010_v10 = vadd.f32 %v3009_v6, %v3008_v50  ;;  %v3065_v59 = vpop.permute.xlu1 %3064 }
 0x81f   : > { %v2944_v13 = vrot.slane %v2943_v7, 4  ;;  %v2968_v14 = vrot.slane %v2967_v8, 4  ;;  %v2992_v53 = vrot.slane %v2991_v9, 4  ;;  %v3016_v52 = vrot.slane %v3015_v45, 4 }
 0x820   : > { %v2939_v11 = vrot.slane %v2938_v57, 2  ;;  %v2963_v12 = vrot.slane %v2962_v60, 2  ;;  %v2987_v46 = vrot.slane %v2986_v58, 2  ;;  %v3011_v15 = vrot.slane %v3010_v10, 2 }
 0x821   : > { %v2945_v20 = vadd.f32 %v2944_v13, %v2943_v7  ;;  %v2969_v22 = vadd.f32 %v2968_v14, %v2967_v8  ;;  %v2993_v23 = vadd.f32 %v2992_v53, %v2991_v9  ;;  %v3017_v27 = vadd.f32 %v3016_v52, %v3015_v45 }
 0x822   : > { %v2940_v21 = vadd.f32 %v2939_v11, %v2938_v57  ;;  %v2964_v24 = vadd.f32 %v2963_v12, %v2962_v60  ;;  %v2988_v25 = vadd.f32 %v2987_v46, %v2986_v58  ;;  %v3012_v33 = vadd.f32 %v3011_v15, %v3010_v10 }
 0x823   : > { %v2946_v28 = vrot.slane %v2945_v20, 2  ;;  %v2970_v1 = vrot.slane %v2969_v22, 2  ;;  %v2994_v3 = vrot.slane %v2993_v23, 2  ;;  %v3018_v31 = vrot.slane %v3017_v27, 2 }
 0x824   : > { %v2941_v29 = vrot.slane %v2940_v21, 1  ;;  %v2965_v30 = vrot.slane %v2964_v24, 1  ;;  %v2989_v32 = vrot.slane %v2988_v25, 1  ;;  %v3013_v41 = vrot.slane %v3012_v33, 1 }
 0x825   : > { %v2947_v16 = vadd.f32 %v2946_v28, %v2945_v20  ;;  %v2971_v34 = vadd.f32 %v2970_v1, %v2969_v22  ;;  %v2995_v18 = vadd.f32 %v2994_v3, %v2993_v23  ;;  %v3019_v19 = vadd.f32 %v3018_v31, %v3017_v27 }
 0x826   : > { %v2942_v17 = vadd.f32 %v2941_v29, %v2940_v21  ;;  %v2966_v49 = vadd.f32 %v2965_v30, %v2964_v24  ;;  %v2990_v39 = vadd.f32 %v2989_v32, %v2988_v25  ;;  %v3014_v50 = vadd.f32 %v3013_v41, %v3012_v33 }
 0x827   : > { %v2948_v35 = vrot.slane %v2947_v16, 1  ;;  %v2972_v36 = vrot.slane %v2971_v34, 1  ;;  %v2996_v37 = vrot.slane %v2995_v18, 1  ;;  %v3020_v38 = vrot.slane %v3019_v19, 1 }
 0x828   : > { %v3023_v42 = vsel %vm3022_vm13, %v2942_v17, %v2966_v49 }
 0x829   : > { %v2949_v40 = vadd.f32 %v2948_v35, %v2947_v16  ;;  %v2973_v43 = vadd.f32 %v2972_v36, %v2971_v34  ;;  %v2997_v44 = vadd.f32 %v2996_v37, %v2995_v18  ;;  %v3021_v47 = vadd.f32 %v3020_v38, %v3019_v19 }
 0x82a   : > { %v3025_v48 = vsel %vm960_vm1, %v3023_v42, %v2990_v39 }
 0x82b   : > { %v3024_v26 = vsel %vm3022_vm13, %v2949_v40, %v2973_v43  ;;  %v3028_v54 = vsel %vm3027_vm14, %v3025_v48, %v3014_v50 }
 0x82c   : > { %v3026_v0 = vsel %vm960_vm1, %v3024_v26, %v2997_v44 }
 0x82d   : > { %v3029_v51 = vsel %vm3027_vm14, %v3026_v0, %v3021_v47 }
 0x82e   : > { %3131 = vmatprep.mubr.f32.mxu0 %v3029_v51 }
 0x82f   : > { %3132 = vmatmul.mubr.f32.vlgmr.msra.gmra.mxu0 %v3028_v54 }
 0x8ef   : > { %v3508_v55 = vpop.f32.mrf.mxu0 }
 0x8f1   : > { %v3509_v56 = vpop.f32.mrf.mxu0 }
 0x8f2   : > { %v3510_v61 = vadd.f32 %v3509_v56, %v3508_v55 }
 0x8f4   : > { %v3134_v62 = vadd.f32 %v3510_v61, %v3065_v59 }
 0x8f6   : > { %v3138_v63 = vsel %vm3137_vm15, %v3134_v62, -inf }
 0x8f7   : > { %v3139_v2 = vrot.slane %v3138_v63, 4 }
 0x8f9   : > { %v3140_v4 = vmax.f32 %v3138_v63, %v3139_v2 }
 0x8fb   : > { %v3141_v5 = vrot.slane %v3140_v4, 2 }
 0x8fd   : > { %v3142_v6 = vmax.f32 %v3140_v4, %v3141_v5 }
 0x8ff   : > { %v3143_v57 = vrot.slane %v3142_v6, 1 }
 0x901   : > { %v3144_v60 = vmax.f32 %v3142_v6, %v3143_v57 }
 0x903   : > { %v3145_v58 = vsub.f32 %v3134_v62, %v3144_v60 }
 0x905   : > { %v3146_v7 = vmul.f32 1.442695, %v3145_v58 }
 0x907   : > { %3897 = vpow2.f32 %v3146_v7 }
 0x914   : > { %v3898_v8 = vpop.eup %3897 }
 0x915   : > { %v3148_v9 = vsel %vm3137_vm15, %v3898_v8, 0.0 }
 0x916   : > { %v3149_v45 = vrot.slane %v3148_v9, 4 }
 0x918   : > { %v3150_v10 = vadd.f32 %v3149_v45, %v3148_v9 }
 0x91a   : > { %v3151_v11 = vrot.slane %v3150_v10, 2 }
 0x91c   : > { %v3152_v12 = vadd.f32 %v3151_v11, %v3150_v10 }
 0x91e   : > { %v3153_v13 = vrot.slane %v3152_v12, 1 }
 0x920   : > { %v3154_v46 = vadd.f32 %v3153_v13, %v3152_v12 }
 0x922   : > { %3899 = vrcp.f32 %v3154_v46 }
 0x92f   : > { %v3900_v14 = vpop.eup %3899 }
 0x930   : > { %v3156_v53 = vmul.f32 %v3900_v14, %v3898_v8 }
 0x932   : > { %3157 = vst.msk [vmem:[%s303_s17] sm:$0xf] %vm3137_vm15, %v3156_v53 }
 0x933 PF: > { %s18_s27 = sadd.s32 1, %s3909_s27  }
 0x934   : > { %p15_p4 = scmp.ge.s32.totalorder %s18_s27, 4  }
 0x936   :  { %17 = sbr.rel (!%p15_p4) target bundleno = 1 (0x1), region = 82 }

</bundles_post_ra>
